<compile_context>
chip_gen: v6e
topology: v6e:2x2x1
jax: 0.10.0
libtpu: 0.0.40
codegen_flags: <defaults>
</compile_context>

<pallas_src>
import jax
import jax.numpy as jnp
from jax.experimental import pallas as pl
from jax.experimental.pallas import tpu as pltpu

# ------------------------------------------------------------------
# Scaled-down dims (module constants EMBED_DIM_ConvNextV2=2048, TRANSFORMER_EMBED=768
# are shrunk to keep the demo tiny; everything else is structurally identical).
# ------------------------------------------------------------------
B = 8            # batch (images == captions); 8 => full f32 sublane occupancy
C, H, W = 3, 16, 16
PATCH = 4
P = (H // PATCH) * (W // PATCH)          # 16 patches / image  (B*P = 128 rows)
PATCH_DIM = C * PATCH * PATCH            # 48 (raw patch features)
PATCH_DIM_PAD = 128                      # zero-padded to a lane-aligned K
STEM_DIM = 128
EMBED_DIM = 256                          # stands for EMBED_DIM_ConvNextV2 = 2048
TEXT_DIM = 128                           # stands for TRANSFORMER_EMBED = 768
SEQ = 8                                  # B*SEQ = 64 rows
VOCAB = 97
OUT_LANES = 128                          # packed scalar output slab width
LN_EPS = 1e-5                            # nn.LayerNorm default
NORM_EPS = 1e-12                         # F.normalize default


def _gelu_tanh(x):
    # tanh approximation of GELU (EUP-friendly).
    return 0.5 * x * (1.0 + jnp.tanh(0.7978845608028654 * (x + 0.044715 * x * x * x)))


def _full_spec(shape):
    nd = len(shape)
    return pl.BlockSpec(shape, lambda i, _nd=nd: (0,) * _nd)


_CPARAMS = pltpu.CompilerParams(dimension_semantics=("arbitrary",))


# ------------------------------------------------------------------
# Fused kernel: vision encoder surrogate + text encoder surrogate + exact Projection
# head + normalize + similarity + CLIP loss + metrics.  Single launch, single output.
# ------------------------------------------------------------------
def _align_kernel(patches_ref, w_stem_ref, w_head_ref,
                  emb_ref, maskf_ref, invcnt_ref,
                  w_enc_ref, w1_ref, w2_ref, g_ref, b_ref,
                  out_ref):
    f32 = jnp.float32
    bf16 = jnp.bfloat16

    # ---- vision surrogate (ResNet50 w/ fc=Identity): patch stem -> GELU -> GAP -> head ----
    hv = jnp.dot(patches_ref[...], w_stem_ref[...], preferred_element_type=f32)      # (B*P, STEM)
    hv = _gelu_tanh(hv)
    pooled = jnp.sum(hv.reshape(B, P, STEM_DIM), axis=1) * (1.0 / P)                  # (B, STEM)
    img = jnp.dot(pooled.astype(bf16), w_head_ref[...], preferred_element_type=f32)   # (B, EMBED)

    # ---- text surrogate (DistilBERT CLS): embedding mix -> attention-masked mean pool ----
    ht = jnp.tanh(jnp.dot(emb_ref[...], w_enc_ref[...], preferred_element_type=f32))  # (B*SEQ, TEXT)
    ht = ht * maskf_ref[...]                                                           # zero padded tokens
    cls = jnp.sum(ht.reshape(B, SEQ, TEXT_DIM), axis=1) * invcnt_ref[...]              # (B, TEXT)

    # ---- Projection head (exact structure): linear1 -> gelu -> linear2(dropout=id) -> add -> LN ----
    embed1 = jnp.dot(cls.astype(bf16), w1_ref[...], preferred_element_type=f32)               # (B, EMBED)
    embed2 = jnp.dot(_gelu_tanh(embed1).astype(bf16), w2_ref[...], preferred_element_type=f32)
    e = embed1 + embed2
    mu = jnp.mean(e, axis=-1, keepdims=True)
    var = jnp.mean((e - mu) * (e - mu), axis=-1, keepdims=True)
    proj = (e - mu) * jax.lax.rsqrt(var + LN_EPS) * g_ref[...] + b_ref[...]

    # projected_vec / ||projected_vec||  (eps-clamped against zero vectors)
    cap = proj * jax.lax.rsqrt(
        jnp.maximum(jnp.sum(proj * proj, -1, keepdims=True), NORM_EPS * NORM_EPS))

    # ---- F.normalize(p=2, dim=-1) on both embeds ----
    img_n = img * jax.lax.rsqrt(
        jnp.maximum(jnp.sum(img * img, -1, keepdims=True), NORM_EPS * NORM_EPS))
    cap_n = cap * jax.lax.rsqrt(
        jnp.maximum(jnp.sum(cap * cap, -1, keepdims=True), NORM_EPS * NORM_EPS))

    # ---- similarity = caption_embed @ image_embed.T  (rows = captions, cols = images) ----
    sim = jax.lax.dot_general(cap_n, img_n, (((1,), (1,)), ((), ())),
                              preferred_element_type=f32)                              # (B, B)

    n = B
    row = jax.lax.broadcasted_iota(jnp.int32, (n, n), 0)
    col = jax.lax.broadcasted_iota(jnp.int32, (n, n), 1)
    on_diag = row == col
    sim_diag = jnp.where(on_diag, sim, 0.0)
    diag_r = jnp.sum(sim_diag, axis=1, keepdims=True)    # (n, 1)
    diag_c = jnp.sum(sim_diag, axis=0, keepdims=True)    # (1, n)

    # CLIP_loss: loss_t = CE(sim, arange) over rows; loss_i = CE(sim.T, arange) over cols
    rmax = jnp.max(sim, axis=1, keepdims=True)
    lse_r = rmax + jnp.log(jnp.sum(jnp.exp(sim - rmax), axis=1, keepdims=True))
    loss_t = jnp.sum(lse_r - diag_r, axis=0, keepdims=True) * (1.0 / n)                # (1, 1)
    cmax = jnp.max(sim, axis=0, keepdims=True)
    lse_c = cmax + jnp.log(jnp.sum(jnp.exp(sim - cmax), axis=0, keepdims=True))
    loss_i = jnp.sum(lse_c - diag_c, axis=1, keepdims=True) * (1.0 / n)                # (1, 1)
    loss = 0.5 * (loss_i + loss_t)

    # metrics: argmax(dim=1) == arange, argmax(dim=0) == arange (first-max tie rule)
    idx_r = jnp.min(jnp.where(sim == rmax, col, n), axis=1, keepdims=True)             # (n, 1)
    iacc = jnp.sum((idx_r == row[:, 0:1]).astype(f32), axis=0, keepdims=True) * (1.0 / n)
    idx_c = jnp.min(jnp.where(sim == cmax, row, n), axis=0, keepdims=True)             # (1, n)
    cacc = jnp.sum((idx_c == col[0:1, :]).astype(f32), axis=1, keepdims=True) * (1.0 / n)

    # pack the three scalars into one lane-dense (1, OUT_LANES) slab: [loss, img_acc, cap_acc, 0...]
    lane = jax.lax.broadcasted_iota(jnp.int32, (1, OUT_LANES), 1)
    out_ref[...] = (loss * (lane == 0).astype(f32)
                    + iacc * (lane == 1).astype(f32)
                    + cacc * (lane == 2).astype(f32))


def align_forward(*operands):
    return pl.pallas_call(
        _align_kernel,
        out_shape=jax.ShapeDtypeStruct((1, OUT_LANES), jnp.float32),
        grid=(1,),
        in_specs=[_full_spec(op.shape) for op in operands],
        out_specs=_full_spec((1, OUT_LANES)),
        compiler_params=_CPARAMS,
    )(*operands)


# ------------------------------------------------------------------
# Parameters (deterministic, in-script; nn.Linear weights kept as [in, out], bf16)
# ------------------------------------------------------------------
def init_params(key):
    ks = jax.random.split(key, 6)
    s = lambda fan_in: 1.0 / jnp.sqrt(jnp.float32(fan_in))
    w_stem = jax.random.normal(ks[2], (PATCH_DIM, STEM_DIM), jnp.float32) * s(PATCH_DIM)
    w_stem_pad = jnp.zeros((PATCH_DIM_PAD, STEM_DIM), jnp.float32).at[:PATCH_DIM, :].set(w_stem)
    return {
        "emb_table": jax.random.normal(ks[0], (VOCAB, TEXT_DIM), jnp.float32) * 0.02,
        "w_enc": (jax.random.normal(ks[1], (TEXT_DIM, TEXT_DIM), jnp.float32) * s(TEXT_DIM)).astype(jnp.bfloat16),
        "w_stem": w_stem_pad.astype(jnp.bfloat16),
        "w_head": (jax.random.normal(ks[3], (STEM_DIM, EMBED_DIM), jnp.float32) * s(STEM_DIM)).astype(jnp.bfloat16),
        "w1": (jax.random.normal(ks[4], (TEXT_DIM, EMBED_DIM), jnp.float32) * s(TEXT_DIM)).astype(jnp.bfloat16),
        "w2": (jax.random.normal(ks[5], (EMBED_DIM, EMBED_DIM), jnp.float32) * s(EMBED_DIM)).astype(jnp.bfloat16),
        "ln_gamma": jnp.ones((1, EMBED_DIM), jnp.float32),   # nn.LayerNorm default init
        "ln_beta": jnp.zeros((1, EMBED_DIM), jnp.float32),
    }


# ------------------------------------------------------------------
# Forward (layout glue in plain JAX; everything hot inside the single Pallas kernel)
# ------------------------------------------------------------------
@jax.jit
def model_forward(params, images, input_ids, attention_mask):
    # ---- vision: patchify NCHW -> [B*P, PATCH_DIM], zero-pad features to lane-aligned K ----
    x = images.reshape(B, C, H // PATCH, PATCH, W // PATCH, PATCH)
    x = jnp.transpose(x, (0, 2, 4, 1, 3, 5)).reshape(B * P, PATCH_DIM).astype(jnp.float32)
    patches = jnp.zeros((B * P, PATCH_DIM_PAD), jnp.float32).at[:, :PATCH_DIM].set(x)
    patches = patches.astype(jnp.bfloat16)

    # ---- text: embedding lookup (gather stays in XLA), mask as per-token scale ----
    emb = params["emb_table"][input_ids].reshape(B * SEQ, TEXT_DIM).astype(jnp.bfloat16)
    maskf = attention_mask.astype(jnp.float32).reshape(B * SEQ, 1)
    inv_cnt = 1.0 / jnp.maximum(
        jnp.sum(attention_mask.astype(jnp.float32), axis=1, keepdims=True), 1.0)      # (B, 1)

    out = align_forward(patches, params["w_stem"], params["w_head"],
                        emb, maskf, inv_cnt,
                        params["w_enc"], params["w1"], params["w2"],
                        params["ln_gamma"], params["ln_beta"])
    return out[0, 0], out[0, 1], out[0, 2]


if __name__ == "__main__":
    key = jax.random.PRNGKey(0)
    k_img, k_ids, k_len, k_par = jax.random.split(key, 4)

    images = jax.random.normal(k_img, (B, C, H, W), jnp.float32)          # NCHW, like PyTorch
    input_ids = jax.random.randint(k_ids, (B, SEQ), 0, VOCAB, jnp.int32)
    lengths = jax.random.randint(k_len, (B,), 4, SEQ + 1, jnp.int32)
    attention_mask = (jnp.arange(SEQ)[None, :] < lengths[:, None]).astype(jnp.int32)

    params = init_params(k_par)
    loss, img_acc, cap_acc = model_forward(params, images, input_ids, attention_mask)
    jax.block_until_ready((loss, img_acc, cap_acc))
    print("KERNEL_OK")
</pallas_src>

<mosaic_0001>
module attributes {stable_mosaic.version = 11 : i64} {
  func.func @_align_kernel(%arg0: i32, %arg1: memref<128x128xbf16, #tpu.memory_space<vmem>>, %arg2: memref<128x128xbf16, #tpu.memory_space<vmem>>, %arg3: memref<128x256xbf16, #tpu.memory_space<vmem>>, %arg4: memref<64x128xbf16, #tpu.memory_space<vmem>>, %arg5: memref<64x1xf32, #tpu.memory_space<vmem>>, %arg6: memref<8x1xf32, #tpu.memory_space<vmem>>, %arg7: memref<128x128xbf16, #tpu.memory_space<vmem>>, %arg8: memref<128x256xbf16, #tpu.memory_space<vmem>>, %arg9: memref<256x256xbf16, #tpu.memory_space<vmem>>, %arg10: memref<1x256xf32, #tpu.memory_space<vmem>>, %arg11: memref<1x256xf32, #tpu.memory_space<vmem>>, %arg12: memref<1x128xf32, #tpu.memory_space<vmem>>) attributes {dimension_semantics = [#tpu.dimension_semantics<arbitrary>], iteration_bounds = array<i64: 1>, scalar_prefetch = 0 : i64, scratch_operands = 0 : i64, tpu.core_type = #tpu.core_type<tc>, window_params = [{pipeline_mode = #tpu.pipeline_mode<synchronous>, transform_indices = @transform_0, window_bounds = array<i64: 128, 128>}, {pipeline_mode = #tpu.pipeline_mode<synchronous>, transform_indices = @transform_1, window_bounds = array<i64: 128, 128>}, {pipeline_mode = #tpu.pipeline_mode<synchronous>, transform_indices = @transform_2, window_bounds = array<i64: 128, 256>}, {pipeline_mode = #tpu.pipeline_mode<synchronous>, transform_indices = @transform_3, window_bounds = array<i64: 64, 128>}, {pipeline_mode = #tpu.pipeline_mode<synchronous>, transform_indices = @transform_4, window_bounds = array<i64: 64, 1>}, {pipeline_mode = #tpu.pipeline_mode<synchronous>, transform_indices = @transform_5, window_bounds = array<i64: 8, 1>}, {pipeline_mode = #tpu.pipeline_mode<synchronous>, transform_indices = @transform_6, window_bounds = array<i64: 128, 128>}, {pipeline_mode = #tpu.pipeline_mode<synchronous>, transform_indices = @transform_7, window_bounds = array<i64: 128, 256>}, {pipeline_mode = #tpu.pipeline_mode<synchronous>, transform_indices = @transform_8, window_bounds = array<i64: 256, 256>}, {pipeline_mode = #tpu.pipeline_mode<synchronous>, transform_indices = @transform_9, window_bounds = array<i64: 1, 256>}, {pipeline_mode = #tpu.pipeline_mode<synchronous>, transform_indices = @transform_10, window_bounds = array<i64: 1, 256>}, {pipeline_mode = #tpu.pipeline_mode<synchronous>, transform_indices = @transform_11, window_bounds = array<i64: 1, 128>}]} {
    %c0 = arith.constant 0 : index
    %c0_0 = arith.constant 0 : index
    %0 = vector.load %arg1[%c0, %c0_0] : memref<128x128xbf16, #tpu.memory_space<vmem>>, vector<128x128xbf16>
    %c0_1 = arith.constant 0 : index
    %c0_2 = arith.constant 0 : index
    %1 = vector.load %arg2[%c0_1, %c0_2] : memref<128x128xbf16, #tpu.memory_space<vmem>>, vector<128x128xbf16>
    %cst = arith.constant dense<0.000000e+00> : vector<128x128xf32>
    %2 = tpu.matmul %0, %1, %cst {dimension_numbers = #tpu.dot_dimension_numbers<[1], [0], [0], [1], [0, 0, 1, 1], [], []>} : vector<128x128xbf16>, vector<128x128xbf16>, vector<128x128xf32> -> vector<128x128xf32>
    %cst_3 = arith.constant 5.000000e-01 : f32
    %3 = vector.broadcast %cst_3 : f32 to vector<128x128xf32>
    %4 = arith.mulf %3, %2 : vector<128x128xf32>
    %cst_4 = arith.constant 4.471500e-02 : f32
    %5 = vector.broadcast %cst_4 : f32 to vector<128x128xf32>
    %6 = arith.mulf %5, %2 : vector<128x128xf32>
    %7 = arith.mulf %6, %2 : vector<128x128xf32>
    %8 = arith.mulf %7, %2 : vector<128x128xf32>
    %9 = arith.addf %2, %8 : vector<128x128xf32>
    %cst_5 = arith.constant 0.797884583 : f32
    %10 = vector.broadcast %cst_5 : f32 to vector<128x128xf32>
    %11 = arith.mulf %10, %9 : vector<128x128xf32>
    %12 = math.tanh %11 : vector<128x128xf32>
    %cst_6 = arith.constant 1.000000e+00 : f32
    %13 = vector.broadcast %cst_6 : f32 to vector<128x128xf32>
    %14 = arith.addf %13, %12 : vector<128x128xf32>
    %15 = arith.mulf %4, %14 : vector<128x128xf32>
    %16 = vector.shape_cast %15 : vector<128x128xf32> to vector<8x16x128xf32>
    %cst_7 = arith.constant dense<0.000000e+00> : vector<8x128xf32>
    %17 = vector.multi_reduction <add>, %16, %cst_7 [1] : vector<8x16x128xf32> to vector<8x128xf32>
    %cst_8 = arith.constant 6.250000e-02 : f32
    %18 = vector.broadcast %cst_8 : f32 to vector<8x128xf32>
    %19 = arith.mulf %17, %18 : vector<8x128xf32>
    %20 = arith.truncf %19 : vector<8x128xf32> to vector<8x128xbf16>
    %c0_9 = arith.constant 0 : index
    %c0_10 = arith.constant 0 : index
    %21 = vector.load %arg3[%c0_9, %c0_10] : memref<128x256xbf16, #tpu.memory_space<vmem>>, vector<128x256xbf16>
    %cst_11 = arith.constant dense<0.000000e+00> : vector<8x256xf32>
    %22 = tpu.matmul %20, %21, %cst_11 {dimension_numbers = #tpu.dot_dimension_numbers<[1], [0], [0], [1], [0, 0, 1, 1], [], []>} : vector<8x128xbf16>, vector<128x256xbf16>, vector<8x256xf32> -> vector<8x256xf32>
    %c0_12 = arith.constant 0 : index
    %c0_13 = arith.constant 0 : index
    %23 = vector.load %arg4[%c0_12, %c0_13] : memref<64x128xbf16, #tpu.memory_space<vmem>>, vector<64x128xbf16>
    %c0_14 = arith.constant 0 : index
    %c0_15 = arith.constant 0 : index
    %24 = vector.load %arg7[%c0_14, %c0_15] : memref<128x128xbf16, #tpu.memory_space<vmem>>, vector<128x128xbf16>
    %cst_16 = arith.constant dense<0.000000e+00> : vector<64x128xf32>
    %25 = tpu.matmul %23, %24, %cst_16 {dimension_numbers = #tpu.dot_dimension_numbers<[1], [0], [0], [1], [0, 0, 1, 1], [], []>} : vector<64x128xbf16>, vector<128x128xbf16>, vector<64x128xf32> -> vector<64x128xf32>
    %26 = math.tanh %25 : vector<64x128xf32>
    %c0_17 = arith.constant 0 : index
    %c0_18 = arith.constant 0 : index
    %27 = vector.load %arg5[%c0_17, %c0_18] : memref<64x1xf32, #tpu.memory_space<vmem>>, vector<64x1xf32>
    %28 = vector.broadcast %27 : vector<64x1xf32> to vector<64x128xf32>
    %29 = arith.mulf %26, %28 : vector<64x128xf32>
    %30 = vector.shape_cast %29 : vector<64x128xf32> to vector<8x8x128xf32>
    %cst_19 = arith.constant dense<0.000000e+00> : vector<8x128xf32>
    %31 = vector.multi_reduction <add>, %30, %cst_19 [1] : vector<8x8x128xf32> to vector<8x128xf32>
    %c0_20 = arith.constant 0 : index
    %c0_21 = arith.constant 0 : index
    %32 = vector.load %arg6[%c0_20, %c0_21] : memref<8x1xf32, #tpu.memory_space<vmem>>, vector<8x1xf32>
    %33 = vector.broadcast %32 : vector<8x1xf32> to vector<8x128xf32>
    %34 = arith.mulf %31, %33 : vector<8x128xf32>
    %35 = arith.truncf %34 : vector<8x128xf32> to vector<8x128xbf16>
    %c0_22 = arith.constant 0 : index
    %c0_23 = arith.constant 0 : index
    %36 = vector.load %arg8[%c0_22, %c0_23] : memref<128x256xbf16, #tpu.memory_space<vmem>>, vector<128x256xbf16>
    %cst_24 = arith.constant dense<0.000000e+00> : vector<8x256xf32>
    %37 = tpu.matmul %35, %36, %cst_24 {dimension_numbers = #tpu.dot_dimension_numbers<[1], [0], [0], [1], [0, 0, 1, 1], [], []>} : vector<8x128xbf16>, vector<128x256xbf16>, vector<8x256xf32> -> vector<8x256xf32>
    %cst_25 = arith.constant 5.000000e-01 : f32
    %38 = vector.broadcast %cst_25 : f32 to vector<8x256xf32>
    %39 = arith.mulf %38, %37 : vector<8x256xf32>
    %cst_26 = arith.constant 4.471500e-02 : f32
    %40 = vector.broadcast %cst_26 : f32 to vector<8x256xf32>
    %41 = arith.mulf %40, %37 : vector<8x256xf32>
    %42 = arith.mulf %41, %37 : vector<8x256xf32>
    %43 = arith.mulf %42, %37 : vector<8x256xf32>
    %44 = arith.addf %37, %43 : vector<8x256xf32>
    %cst_27 = arith.constant 0.797884583 : f32
    %45 = vector.broadcast %cst_27 : f32 to vector<8x256xf32>
    %46 = arith.mulf %45, %44 : vector<8x256xf32>
    %47 = math.tanh %46 : vector<8x256xf32>
    %cst_28 = arith.constant 1.000000e+00 : f32
    %48 = vector.broadcast %cst_28 : f32 to vector<8x256xf32>
    %49 = arith.addf %48, %47 : vector<8x256xf32>
    %50 = arith.mulf %39, %49 : vector<8x256xf32>
    %51 = arith.truncf %50 : vector<8x256xf32> to vector<8x256xbf16>
    %c0_29 = arith.constant 0 : index
    %c0_30 = arith.constant 0 : index
    %52 = vector.load %arg9[%c0_29, %c0_30] : memref<256x256xbf16, #tpu.memory_space<vmem>>, vector<256x256xbf16>
    %cst_31 = arith.constant dense<0.000000e+00> : vector<8x256xf32>
    %53 = tpu.matmul %51, %52, %cst_31 {dimension_numbers = #tpu.dot_dimension_numbers<[1], [0], [0], [1], [0, 0, 1, 1], [], []>} : vector<8x256xbf16>, vector<256x256xbf16>, vector<8x256xf32> -> vector<8x256xf32>
    %54 = arith.addf %37, %53 : vector<8x256xf32>
    %cst_32 = arith.constant dense<0.000000e+00> : vector<8xf32>
    %55 = vector.multi_reduction <add>, %54, %cst_32 [1] : vector<8x256xf32> to vector<8xf32>
    %56 = vector.shape_cast %55 : vector<8xf32> to vector<8x1xf32>
    %cst_33 = arith.constant 2.560000e+02 : f32
    %57 = vector.broadcast %cst_33 : f32 to vector<8x1xf32>
    %58 = arith.divf %56, %57 : vector<8x1xf32>
    %59 = vector.broadcast %58 : vector<8x1xf32> to vector<8x256xf32>
    %60 = arith.subf %54, %59 : vector<8x256xf32>
    %61 = vector.broadcast %58 : vector<8x1xf32> to vector<8x256xf32>
    %62 = arith.subf %54, %61 : vector<8x256xf32>
    %63 = arith.mulf %60, %62 : vector<8x256xf32>
    %cst_34 = arith.constant dense<0.000000e+00> : vector<8xf32>
    %64 = vector.multi_reduction <add>, %63, %cst_34 [1] : vector<8x256xf32> to vector<8xf32>
    %65 = vector.shape_cast %64 : vector<8xf32> to vector<8x1xf32>
    %cst_35 = arith.constant 2.560000e+02 : f32
    %66 = vector.broadcast %cst_35 : f32 to vector<8x1xf32>
    %67 = arith.divf %65, %66 : vector<8x1xf32>
    %68 = vector.broadcast %58 : vector<8x1xf32> to vector<8x256xf32>
    %69 = arith.subf %54, %68 : vector<8x256xf32>
    %cst_36 = arith.constant 9.99999974E-6 : f32
    %70 = vector.broadcast %cst_36 : f32 to vector<8x1xf32>
    %71 = arith.addf %67, %70 : vector<8x1xf32>
    %72 = math.rsqrt %71 : vector<8x1xf32>
    %73 = vector.broadcast %72 : vector<8x1xf32> to vector<8x256xf32>
    %74 = arith.mulf %69, %73 : vector<8x256xf32>
    %c0_37 = arith.constant 0 : index
    %c0_38 = arith.constant 0 : index
    %75 = vector.load %arg10[%c0_37, %c0_38] : memref<1x256xf32, #tpu.memory_space<vmem>>, vector<1x256xf32>
    %76 = vector.broadcast %75 : vector<1x256xf32> to vector<8x256xf32>
    %77 = arith.mulf %74, %76 : vector<8x256xf32>
    %c0_39 = arith.constant 0 : index
    %c0_40 = arith.constant 0 : index
    %78 = vector.load %arg11[%c0_39, %c0_40] : memref<1x256xf32, #tpu.memory_space<vmem>>, vector<1x256xf32>
    %79 = vector.broadcast %78 : vector<1x256xf32> to vector<8x256xf32>
    %80 = arith.addf %77, %79 : vector<8x256xf32>
    %81 = arith.mulf %80, %80 : vector<8x256xf32>
    %cst_41 = arith.constant dense<0.000000e+00> : vector<8xf32>
    %82 = vector.multi_reduction <add>, %81, %cst_41 [1] : vector<8x256xf32> to vector<8xf32>
    %83 = vector.shape_cast %82 : vector<8xf32> to vector<8x1xf32>
    %cst_42 = arith.constant 1.000000e-24 : f32
    %84 = vector.broadcast %cst_42 : f32 to vector<8x1xf32>
    %85 = arith.maximumf %83, %84 : vector<8x1xf32>
    %86 = math.rsqrt %85 : vector<8x1xf32>
    %87 = vector.broadcast %86 : vector<8x1xf32> to vector<8x256xf32>
    %88 = arith.mulf %80, %87 : vector<8x256xf32>
    %89 = arith.mulf %22, %22 : vector<8x256xf32>
    %cst_43 = arith.constant dense<0.000000e+00> : vector<8xf32>
    %90 = vector.multi_reduction <add>, %89, %cst_43 [1] : vector<8x256xf32> to vector<8xf32>
    %91 = vector.shape_cast %90 : vector<8xf32> to vector<8x1xf32>
    %cst_44 = arith.constant 1.000000e-24 : f32
    %92 = vector.broadcast %cst_44 : f32 to vector<8x1xf32>
    %93 = arith.maximumf %91, %92 : vector<8x1xf32>
    %94 = math.rsqrt %93 : vector<8x1xf32>
    %95 = vector.broadcast %94 : vector<8x1xf32> to vector<8x256xf32>
    %96 = arith.mulf %22, %95 : vector<8x256xf32>
    %97 = arith.mulf %88, %88 : vector<8x256xf32>
    %cst_45 = arith.constant dense<0.000000e+00> : vector<8xf32>
    %98 = vector.multi_reduction <add>, %97, %cst_45 [1] : vector<8x256xf32> to vector<8xf32>
    %99 = vector.shape_cast %98 : vector<8xf32> to vector<8x1xf32>
    %cst_46 = arith.constant 1.000000e-24 : f32
    %100 = vector.broadcast %cst_46 : f32 to vector<8x1xf32>
    %101 = arith.maximumf %99, %100 : vector<8x1xf32>
    %102 = math.rsqrt %101 : vector<8x1xf32>
    %103 = vector.broadcast %102 : vector<8x1xf32> to vector<8x256xf32>
    %104 = arith.mulf %88, %103 : vector<8x256xf32>
    %cst_47 = arith.constant dense<0.000000e+00> : vector<8x8xf32>
    %105 = tpu.matmul %104, %96, %cst_47 {dimension_numbers = #tpu.dot_dimension_numbers<[1], [1], [0], [0], [0, 0, 1, 0], [], []>} : vector<8x256xf32>, vector<8x256xf32>, vector<8x8xf32> -> vector<8x8xf32>
    %106 = tpu.iota {dimensions = array<i32: 0>} : vector<8x8xi32>
    %107 = tpu.iota {dimensions = array<i32: 1>} : vector<8x8xi32>
    %108 = arith.cmpi eq, %106, %107 : vector<8x8xi32>
    %cst_48 = arith.constant 0.000000e+00 : f32
    %109 = vector.broadcast %cst_48 : f32 to vector<8x8xf32>
    %110 = arith.select %108, %105, %109 : vector<8x8xi1>, vector<8x8xf32>
    %cst_49 = arith.constant dense<0.000000e+00> : vector<8xf32>
    %111 = vector.multi_reduction <add>, %110, %cst_49 [1] : vector<8x8xf32> to vector<8xf32>
    %112 = vector.shape_cast %111 : vector<8xf32> to vector<8x1xf32>
    %cst_50 = arith.constant dense<0.000000e+00> : vector<8xf32>
    %113 = vector.multi_reduction <add>, %110, %cst_50 [0] : vector<8x8xf32> to vector<8xf32>
    %114 = vector.shape_cast %113 : vector<8xf32> to vector<1x8xf32>
    %cst_51 = arith.constant dense<0xFF800000> : vector<8xf32>
    %115 = vector.multi_reduction <maximumf>, %105, %cst_51 [1] : vector<8x8xf32> to vector<8xf32>
    %116 = vector.shape_cast %115 : vector<8xf32> to vector<8x1xf32>
    %117 = vector.broadcast %116 : vector<8x1xf32> to vector<8x8xf32>
    %118 = arith.subf %105, %117 : vector<8x8xf32>
    %119 = math.exp %118 : vector<8x8xf32>
    %cst_52 = arith.constant dense<0.000000e+00> : vector<8xf32>
    %120 = vector.multi_reduction <add>, %119, %cst_52 [1] : vector<8x8xf32> to vector<8xf32>
    %121 = vector.shape_cast %120 : vector<8xf32> to vector<8x1xf32>
    %122 = math.log %121 : vector<8x1xf32>
    %123 = arith.addf %116, %122 : vector<8x1xf32>
    %124 = arith.subf %123, %112 : vector<8x1xf32>
    %cst_53 = arith.constant dense<0.000000e+00> : vector<1xf32>
    %125 = vector.multi_reduction <add>, %124, %cst_53 [0] : vector<8x1xf32> to vector<1xf32>
    %126 = vector.shape_cast %125 : vector<1xf32> to vector<1x1xf32>
    %cst_54 = arith.constant 1.250000e-01 : f32
    %127 = vector.broadcast %cst_54 : f32 to vector<1x1xf32>
    %128 = arith.mulf %126, %127 : vector<1x1xf32>
    %cst_55 = arith.constant dense<0xFF800000> : vector<8xf32>
    %129 = vector.multi_reduction <maximumf>, %105, %cst_55 [0] : vector<8x8xf32> to vector<8xf32>
    %130 = vector.shape_cast %129 : vector<8xf32> to vector<1x8xf32>
    %131 = vector.broadcast %130 : vector<1x8xf32> to vector<8x8xf32>
    %132 = arith.subf %105, %131 : vector<8x8xf32>
    %133 = math.exp %132 : vector<8x8xf32>
    %cst_56 = arith.constant dense<0.000000e+00> : vector<8xf32>
    %134 = vector.multi_reduction <add>, %133, %cst_56 [0] : vector<8x8xf32> to vector<8xf32>
    %135 = vector.shape_cast %134 : vector<8xf32> to vector<1x8xf32>
    %136 = math.log %135 : vector<1x8xf32>
    %137 = arith.addf %130, %136 : vector<1x8xf32>
    %138 = arith.subf %137, %114 : vector<1x8xf32>
    %cst_57 = arith.constant dense<0.000000e+00> : vector<1xf32>
    %139 = vector.multi_reduction <add>, %138, %cst_57 [1] : vector<1x8xf32> to vector<1xf32>
    %140 = vector.shape_cast %139 : vector<1xf32> to vector<1x1xf32>
    %cst_58 = arith.constant 1.250000e-01 : f32
    %141 = vector.broadcast %cst_58 : f32 to vector<1x1xf32>
    %142 = arith.mulf %140, %141 : vector<1x1xf32>
    %143 = arith.addf %142, %128 : vector<1x1xf32>
    %cst_59 = arith.constant 5.000000e-01 : f32
    %144 = vector.broadcast %cst_59 : f32 to vector<1x1xf32>
    %145 = arith.mulf %144, %143 : vector<1x1xf32>
    %146 = vector.broadcast %116 : vector<8x1xf32> to vector<8x8xf32>
    %147 = arith.cmpf oeq, %105, %146 : vector<8x8xf32>
    %c8_i32 = arith.constant 8 : i32
    %148 = vector.broadcast %c8_i32 : i32 to vector<8x8xi32>
    %149 = arith.select %147, %107, %148 : vector<8x8xi1>, vector<8x8xi32>
    %cst_60 = arith.constant dense<2147483647> : vector<8xi32>
    %150 = vector.multi_reduction <minsi>, %149, %cst_60 [1] : vector<8x8xi32> to vector<8xi32>
    %151 = vector.shape_cast %150 : vector<8xi32> to vector<8x1xi32>
    %152 = vector.extract_strided_slice %106 {offsets = [0, 0], sizes = [8, 1], strides = [1, 1]} : vector<8x8xi32> to vector<8x1xi32>
    %153 = arith.cmpi eq, %151, %152 : vector<8x1xi32>
    %154 = arith.extui %153 : vector<8x1xi1> to vector<8x1xi32>
    %155 = arith.sitofp %154 : vector<8x1xi32> to vector<8x1xf32>
    %cst_61 = arith.constant dense<0.000000e+00> : vector<1xf32>
    %156 = vector.multi_reduction <add>, %155, %cst_61 [0] : vector<8x1xf32> to vector<1xf32>
    %157 = vector.shape_cast %156 : vector<1xf32> to vector<1x1xf32>
    %cst_62 = arith.constant 1.250000e-01 : f32
    %158 = vector.broadcast %cst_62 : f32 to vector<1x1xf32>
    %159 = arith.mulf %157, %158 : vector<1x1xf32>
    %160 = vector.broadcast %130 : vector<1x8xf32> to vector<8x8xf32>
    %161 = arith.cmpf oeq, %105, %160 : vector<8x8xf32>
    %c8_i32_63 = arith.constant 8 : i32
    %162 = vector.broadcast %c8_i32_63 : i32 to vector<8x8xi32>
    %163 = arith.select %161, %106, %162 : vector<8x8xi1>, vector<8x8xi32>
    %cst_64 = arith.constant dense<2147483647> : vector<8xi32>
    %164 = vector.multi_reduction <minsi>, %163, %cst_64 [0] : vector<8x8xi32> to vector<8xi32>
    %165 = vector.shape_cast %164 : vector<8xi32> to vector<1x8xi32>
    %166 = vector.extract_strided_slice %107 {offsets = [0, 0], sizes = [1, 8], strides = [1, 1]} : vector<8x8xi32> to vector<1x8xi32>
    %167 = arith.cmpi eq, %165, %166 : vector<1x8xi32>
    %168 = arith.extui %167 : vector<1x8xi1> to vector<1x8xi32>
    %169 = arith.sitofp %168 : vector<1x8xi32> to vector<1x8xf32>
    %cst_65 = arith.constant dense<0.000000e+00> : vector<1xf32>
    %170 = vector.multi_reduction <add>, %169, %cst_65 [1] : vector<1x8xf32> to vector<1xf32>
    %171 = vector.shape_cast %170 : vector<1xf32> to vector<1x1xf32>
    %cst_66 = arith.constant 1.250000e-01 : f32
    %172 = vector.broadcast %cst_66 : f32 to vector<1x1xf32>
    %173 = arith.mulf %171, %172 : vector<1x1xf32>
    %174 = tpu.iota {dimensions = array<i32: 1>} : vector<1x128xi32>
    %c0_i32 = arith.constant 0 : i32
    %175 = vector.broadcast %c0_i32 : i32 to vector<1x128xi32>
    %176 = arith.cmpi eq, %174, %175 : vector<1x128xi32>
    %177 = arith.extui %176 : vector<1x128xi1> to vector<1x128xi32>
    %178 = arith.sitofp %177 : vector<1x128xi32> to vector<1x128xf32>
    %179 = vector.broadcast %145 : vector<1x1xf32> to vector<1x128xf32>
    %180 = arith.mulf %179, %178 : vector<1x128xf32>
    %c1_i32 = arith.constant 1 : i32
    %181 = vector.broadcast %c1_i32 : i32 to vector<1x128xi32>
    %182 = arith.cmpi eq, %174, %181 : vector<1x128xi32>
    %183 = arith.extui %182 : vector<1x128xi1> to vector<1x128xi32>
    %184 = arith.sitofp %183 : vector<1x128xi32> to vector<1x128xf32>
    %185 = vector.broadcast %159 : vector<1x1xf32> to vector<1x128xf32>
    %186 = arith.mulf %185, %184 : vector<1x128xf32>
    %187 = arith.addf %180, %186 : vector<1x128xf32>
    %c2_i32 = arith.constant 2 : i32
    %188 = vector.broadcast %c2_i32 : i32 to vector<1x128xi32>
    %189 = arith.cmpi eq, %174, %188 : vector<1x128xi32>
    %190 = arith.extui %189 : vector<1x128xi1> to vector<1x128xi32>
    %191 = arith.sitofp %190 : vector<1x128xi32> to vector<1x128xf32>
    %192 = vector.broadcast %173 : vector<1x1xf32> to vector<1x128xf32>
    %193 = arith.mulf %192, %191 : vector<1x128xf32>
    %194 = arith.addf %187, %193 : vector<1x128xf32>
    %c0_67 = arith.constant 0 : index
    %c0_68 = arith.constant 0 : index
    %195 = vector.load %arg12[%c0_67, %c0_68] : memref<1x128xf32, #tpu.memory_space<vmem>>, vector<1x128xf32>
    tpu.vector_store %arg12[%c0_67, %c0_68], %194 {strides = array<i32>} : memref<1x128xf32, #tpu.memory_space<vmem>>, vector<1x128xf32>,
    return
  }
  func.func @transform_0(%arg0: i32) -> (i32, i32) {
    %c0_i32 = arith.constant 0 : i32
    %c0_i32_0 = arith.constant 0 : i32
    %c0_i32_1 = arith.constant 0 : i32
    return %c0_i32, %c0_i32_0 : i32, i32
  }
  func.func @transform_1(%arg0: i32) -> (i32, i32) {
    %c0_i32 = arith.constant 0 : i32
    %c0_i32_0 = arith.constant 0 : i32
    %c0_i32_1 = arith.constant 0 : i32
    return %c0_i32, %c0_i32_0 : i32, i32
  }
  func.func @transform_2(%arg0: i32) -> (i32, i32) {
    %c0_i32 = arith.constant 0 : i32
    %c0_i32_0 = arith.constant 0 : i32
    %c0_i32_1 = arith.constant 0 : i32
    return %c0_i32, %c0_i32_0 : i32, i32
  }
  func.func @transform_3(%arg0: i32) -> (i32, i32) {
    %c0_i32 = arith.constant 0 : i32
    %c0_i32_0 = arith.constant 0 : i32
    %c0_i32_1 = arith.constant 0 : i32
    return %c0_i32, %c0_i32_0 : i32, i32
  }
  func.func @transform_4(%arg0: i32) -> (i32, i32) {
    %c0_i32 = arith.constant 0 : i32
    %c0_i32_0 = arith.constant 0 : i32
    %c0_i32_1 = arith.constant 0 : i32
    return %c0_i32, %c0_i32_0 : i32, i32
  }
  func.func @transform_5(%arg0: i32) -> (i32, i32) {
    %c0_i32 = arith.constant 0 : i32
    %c0_i32_0 = arith.constant 0 : i32
    %c0_i32_1 = arith.constant 0 : i32
    return %c0_i32, %c0_i32_0 : i32, i32
  }
  func.func @transform_6(%arg0: i32) -> (i32, i32) {
    %c0_i32 = arith.constant 0 : i32
    %c0_i32_0 = arith.constant 0 : i32
    %c0_i32_1 = arith.constant 0 : i32
    return %c0_i32, %c0_i32_0 : i32, i32
  }
  func.func @transform_7(%arg0: i32) -> (i32, i32) {
    %c0_i32 = arith.constant 0 : i32
    %c0_i32_0 = arith.constant 0 : i32
    %c0_i32_1 = arith.constant 0 : i32
    return %c0_i32, %c0_i32_0 : i32, i32
  }
  func.func @transform_8(%arg0: i32) -> (i32, i32) {
    %c0_i32 = arith.constant 0 : i32
    %c0_i32_0 = arith.constant 0 : i32
    %c0_i32_1 = arith.constant 0 : i32
    return %c0_i32, %c0_i32_0 : i32, i32
  }
  func.func @transform_9(%arg0: i32) -> (i32, i32) {
    %c0_i32 = arith.constant 0 : i32
    %c0_i32_0 = arith.constant 0 : i32
    %c0_i32_1 = arith.constant 0 : i32
    return %c0_i32, %c0_i32_0 : i32, i32
  }
  func.func @transform_10(%arg0: i32) -> (i32, i32) {
    %c0_i32 = arith.constant 0 : i32
    %c0_i32_0 = arith.constant 0 : i32
    %c0_i32_1 = arith.constant 0 : i32
    return %c0_i32, %c0_i32_0 : i32, i32
  }
  func.func @transform_11(%arg0: i32) -> (i32, i32) {
    %c0_i32 = arith.constant 0 : i32
    %c0_i32_0 = arith.constant 0 : i32
    %c0_i32_1 = arith.constant 0 : i32
    return %c0_i32, %c0_i32_0 : i32, i32
  }
}

</mosaic_0001>

<bundles_post_ra>
// kernel: model_forward.1
= control target key start
LH: loop header
LB: loop body
LE: loop exit
PB: predicated region body
PF: predicated region fallthrough
CT: control target
= control target key end

     0   :  { %v2028_v1 = vmov 0   ;;  %vm512_vm0 = vcmask 1041409   ;;  %vm514_vm1 = vcmask 1042434   ;;  %vm516_vm2 = vcmask 1043459   ;;  %s2589_s1 = inlined_call_operand.vmem [shape: bf16[128,128], index: 1, kind: input, shape index: {}]   ;;  %s2590_s0 = inlined_call_operand.vmem [shape: bf16[128,128], index: 0, kind: input, shape index: {}]   ;;  %s2591_s6 = inlined_call_operand.vmem [shape: bf16[128,128], index: 6, kind: input, shape index: {}]   ;;  %s2592_s3 = inlined_call_operand.vmem [shape: bf16[64,128], index: 3, kind: input, shape index: {}]   ;;  %s2593_s4 = inlined_call_operand.vmem [shape: f32[64,1], index: 4, kind: input, shape index: {}]   ;;  %s2594_s5 = inlined_call_operand.vmem [shape: f32[8,1], index: 5, kind: input, shape index: {}]   ;;  %s2595_s2 = inlined_call_operand.vmem [shape: bf16[128,256], index: 2, kind: input, shape index: {}]   ;;  %s2596_s7 = inlined_call_operand.vmem [shape: bf16[128,256], index: 7, kind: input, shape index: {}]   ;;  %s2597_s8 = inlined_call_operand.vmem [shape: bf16[256,256], index: 8, kind: input, shape index: {}]   ;;  %s2598_s9 = inlined_call_operand.vmem [shape: f32[1,256], index: 9, kind: input, shape index: {}]   ;;  %s2599_s10 = inlined_call_operand.vmem [shape: f32[1,256], index: 10, kind: input, shape index: {}]   ;;  %s2600_s11 = inlined_call_operand.vmem [shape: f32[1,128], index: 11, kind: output, shape index: {}]  }
   0x1   :  { %v1836_v0 = vld [vmem:[%s2589_s1 + $0x38] sm:$0xff]   ;;  %1834 = vset.pattern.permute.xlu0 %v2028_v1  ;;  %1835 = vset.pattern.permute.xlu1 %v2028_v1  ;;  %v1837_v2 = vld [vmem:[%s2589_s1 + $0x30] sm:$0xff]   ;;  %v1838_v3 = vld [vmem:[%s2589_s1 + $0x28] sm:$0xff]   ;;  %vm518_vm3 = vcmask 1044484   ;;  %vm520_vm4 = vcmask 1045509   ;;  %vm522_vm5 = vcmask 1046534  }
   0x2   :  { %1776 = vmatprep.subr.bf16.mxu1 %v1836_v0  ;;  %v1839_v4 = vld [vmem:[%s2589_s1 + $0x20] sm:$0xff]   ;;  %v1846_v6 = vld [vmem:[%s2591_s6 + $0x38] sm:$0xff]   ;;  %v1847_v7 = vld [vmem:[%s2591_s6 + $0x30] sm:$0xff]   ;;  %vm524_vm6 = vcmask 1047559   ;;  %vm1530_vm7 = vcmask 64512  }
   0x3   :  { %1777 = vmatpush3.bf16.msra.mxu1 %v1836_v0  ;;  %v1844_v5 = vld [vmem:[%s2590_s0] sm:$0xff]   ;;  %v1840_v8 = vld [vmem:[%s2589_s1 + $0x18] sm:$0xff]   ;;  %1808 = vmatprep.subr.bf16.mxu0 %v1846_v6  ;;  %v1850_v9 = vld [vmem:[%s2591_s6 + $0x28] sm:$0xff]  }
   0x4   :  { %1778 = vmatprep.subr.bf16.mxu1 %v1837_v2  ;;  %1792 = vmatprep.mubr.bf16.mxu1 %v1844_v5  ;;  %v1841_v10 = vld [vmem:[%s2589_s1 + $0x10] sm:$0xff]   ;;  %v1851_v11 = vld [vmem:[%s2591_s6 + $0x20] sm:$0xff]   ;;  %v1842_v12 = vld [vmem:[%s2589_s1 + $0x8] sm:$0xff]  }
   0x5   :  { %1809 = vmatpush3.bf16.msra.mxu0 %v1846_v6  ;;  %v1854_v13 = vld [vmem:[%s2591_s6 + $0x18] sm:$0xff]   ;;  %v1843_v14 = vld [vmem:[%s2589_s1] sm:$0xff]   ;;  %v1855_v16 = vld [vmem:[%s2591_s6 + $0x10] sm:$0xff]  }
   0x6   :  { %1810 = vmatprep.subr.bf16.mxu0 %v1847_v7  ;;  %v1860_v15 = vld [vmem:[%s2592_s3] sm:$0xff]   ;;  %v819_v17 = vld [vmem:[%s2593_s4 + $0x8] sm:$0xff]  ;;  %v820_v21 = vld [vmem:[%s2593_s4 + $0x10] sm:$0xff] }
   0x7   :  { %1779 = vmatpush3.bf16.msra.mxu1 %v1837_v2  ;;  %1824 = vmatprep.mubr.bf16.mxu0 %v1860_v15  ;;  %v818_v18 = vld [vmem:[%s2593_s4] sm:$0xff]  ;;  %v1845_v19 = vld [vmem:[%s2590_s0 + $0x8] sm:$0xff]   ;;  %v1848_v22 = vld [vmem:[%s2590_s0 + $0x10] sm:$0xff]  }
   0x8   :  { %1780 = vmatprep.subr.bf16.mxu1 %v1838_v3  ;;  %833 = vperm.xlu0 %1834, %v819_v17   ;;  %v1858_v20 = vld [vmem:[%s2591_s6 + $0x8] sm:$0xff]   ;;  %v821_v23 = vld [vmem:[%s2593_s4 + $0x18] sm:$0xff]  ;;  %v1859_v24 = vld [vmem:[%s2591_s6] sm:$0xff]  }
   0x9   :  { %1811 = vmatpush3.bf16.msra.mxu0 %v1847_v7  ;;  %828 = vperm.xlu1 %1835, %v818_v18   ;;  %v822_v25 = vld [vmem:[%s2593_s4 + $0x20] sm:$0xff]  ;;  %v823_v26 = vld [vmem:[%s2593_s4 + $0x28] sm:$0xff]  ;;  %v1849_v27 = vld [vmem:[%s2590_s0 + $0x18] sm:$0xff]  }
   0xa   :  { %1812 = vmatprep.subr.bf16.mxu0 %v1850_v9  ;;  %v824_v28 = vld [vmem:[%s2593_s4 + $0x30] sm:$0xff]  ;;  %v1852_v29 = vld [vmem:[%s2590_s0 + $0x20] sm:$0xff]   ;;  %v1861_v30 = vld [vmem:[%s2592_s3 + $0x8] sm:$0xff]  }
   0xb   :  { %1781 = vmatpush3.bf16.msra.mxu1 %v1838_v3  ;;  %v825_v31 = vld [vmem:[%s2593_s4 + $0x38] sm:$0xff]  ;;  %v1862_v32 = vld [vmem:[%s2592_s3 + $0x10] sm:$0xff]   ;;  %v922_v33 = vld [vmem:[%s2594_s5] sm:$0xff] }
   0xc   :  { %1782 = vmatprep.subr.bf16.mxu1 %v1839_v4  ;;  %838 = vperm.xlu0 %1834, %v820_v21   ;;  %v1853_v34 = vld [vmem:[%s2590_s0 + $0x28] sm:$0xff]   ;;  %v1856_v35 = vld [vmem:[%s2590_s0 + $0x30] sm:$0xff]   ;;  %v1863_v36 = vld [vmem:[%s2592_s3 + $0x18] sm:$0xff]  }
   0xd   :  { %1813 = vmatpush3.bf16.msra.mxu0 %v1850_v9  ;;  %843 = vperm.xlu1 %1835, %v821_v23   ;;  %v1857_v37 = vld [vmem:[%s2590_s0 + $0x38] sm:$0xff]   ;;  %v1869_v40 = vld [vmem:[%s2595_s2 + $0x64] ss:$8 sps:$4 sm:$0xff]   ;;  %v1867_v41 = vld [vmem:[%s2595_s2 + $0x60] ss:$8 sps:$4 sm:$0xff]  }
   0xe   :  { %1814 = vmatprep.subr.bf16.mxu0 %v1851_v11  ;;  %v1866_v38 = vld [vmem:[%s2595_s2 + $0x74] ss:$8 sps:$4 sm:$0xff]   ;;  %v1864_v39 = vld [vmem:[%s2595_s2 + $0x70] ss:$8 sps:$4 sm:$0xff]   ;;  %v1875_v44 = vld [vmem:[%s2595_s2 + $0x44] ss:$8 sps:$4 sm:$0xff]  }
   0xf   :  { %1783 = vmatpush3.bf16.msra.mxu1 %v1839_v4  ;;  %v1872_v42 = vld [vmem:[%s2595_s2 + $0x54] ss:$8 sps:$4 sm:$0xff]   ;;  %v1870_v43 = vld [vmem:[%s2595_s2 + $0x50] ss:$8 sps:$4 sm:$0xff]   ;;  %v1873_v45 = vld [vmem:[%s2595_s2 + $0x40] ss:$8 sps:$4 sm:$0xff]  }
  0x10   :  { %1784 = vmatprep.subr.bf16.mxu1 %v1840_v8  ;;  %848 = vperm.xlu0 %1834, %v822_v25   ;;  %v1878_v46 = vld [vmem:[%s2595_s2 + $0x34] ss:$8 sps:$4 sm:$0xff]   ;;  %v1876_v47 = vld [vmem:[%s2595_s2 + $0x30] ss:$8 sps:$4 sm:$0xff]   ;;  %v1881_v48 = vld [vmem:[%s2595_s2 + $0x24] ss:$8 sps:$4 sm:$0xff]  }
  0x11   :  { %1815 = vmatpush3.bf16.msra.mxu0 %v1851_v11  ;;  %853 = vperm.xlu1 %1835, %v823_v26   ;;  %v1879_v49 = vld [vmem:[%s2595_s2 + $0x20] ss:$8 sps:$4 sm:$0xff]   ;;  %v1884_v50 = vld [vmem:[%s2595_s2 + $0x14] ss:$8 sps:$4 sm:$0xff]   ;;  %v1882_v51 = vld [vmem:[%s2595_s2 + $0x10] ss:$8 sps:$4 sm:$0xff]  }
  0x12   :  { %1816 = vmatprep.subr.bf16.mxu0 %v1854_v13  ;;  %v1885_v52 = vld [vmem:[%s2595_s2] ss:$8 sps:$4 sm:$0xff]   ;;  %v1887_v53 = vld [vmem:[%s2595_s2 + $0x4] ss:$8 sps:$4 sm:$0xff]   ;;  %v1890_v54 = vld [vmem:[%s2596_s7 + $0x74] ss:$8 sps:$4 sm:$0xff]  }
  0x13   :  { %1785 = vmatpush3.bf16.msra.mxu1 %v1840_v8 }
  0x14   :  { %1786 = vmatprep.subr.bf16.mxu1 %v1841_v10  ;;  %858 = vperm.xlu0 %1834, %v824_v28  }
  0x15   :  { %1817 = vmatpush3.bf16.msra.mxu0 %v1854_v13  ;;  %863 = vperm.xlu1 %1835, %v825_v31  }
  0x16   :  { %1818 = vmatprep.subr.bf16.mxu0 %v1855_v16 }
  0x17   :  { %1787 = vmatpush3.bf16.msra.mxu1 %v1841_v10 }
  0x18   :  { %1788 = vmatprep.subr.bf16.mxu1 %v1842_v12  ;;  %925 = vperm.xlu0 %1834, %v922_v33  }
  0x19   :  { %1819 = vmatpush3.bf16.msra.mxu0 %v1855_v16 }
  0x1a   :  { %1820 = vmatprep.subr.bf16.mxu0 %v1858_v20 }
  0x1b   :  { %1789 = vmatpush3.bf16.msra.mxu1 %v1842_v12 }
  0x1c   :  { %1790 = vmatprep.subr.bf16.mxu1 %v1843_v14 }
  0x1d   :  { %1821 = vmatpush3.bf16.msra.mxu0 %v1858_v20 }
  0x1e   :  { %1822 = vmatprep.subr.bf16.mxu0 %v1859_v24 }
  0x1f   :  { %1791 = vmatpush3.bf16.msra.mxu1 %v1843_v14 }
  0x20   :  { %608 = vmatprep.subr.bf16.mxu1 %v1866_v38 }
  0x21   :  { %1823 = vmatpush3.bf16.msra.mxu0 %v1859_v24 }
  0x22   :  { %1793 = vmatmul.mubr.bf16.vlgmr.msra.gmra.mxu1 %v1845_v19 }
  0x23   :  { %1796 = vmatprep.mubr.bf16.mxu1 %v1848_v22  ;;  %609 = vmatpush1.bf16.msra.mxu1 %v1864_v39 }
  0x24   :  { %1825 = vmatmul.mubr.bf16.vlgmr.msra.gmra.mxu0 %v1861_v30  ;;  %610 = vmatprep.subr.bf16.mxu1 %v1869_v40 }
  0x25   :  { %1828 = vmatprep.mubr.bf16.mxu0 %v1862_v32 }
  0x27   :  { %611 = vmatpush1.bf16.msra.mxu1 %v1867_v41 }
  0x28   :  { %612 = vmatprep.subr.bf16.mxu1 %v1872_v42 }
  0x2a   :  { %1797 = vmatmul.mubr.bf16.gmra.mxu1 %v1849_v27 }
  0x2b   :  { %1800 = vmatprep.mubr.bf16.mxu1 %v1852_v29  ;;  %613 = vmatpush1.bf16.msra.mxu1 %v1870_v43 }
  0x2c   :  { %1829 = vmatmul.mubr.bf16.gmra.mxu0 %v1863_v36  ;;  %614 = vmatprep.subr.bf16.mxu1 %v1875_v44 }
  0x2f   :  { %615 = vmatpush1.bf16.msra.mxu1 %v1873_v45 }
  0x30   :  { %616 = vmatprep.subr.bf16.mxu1 %v1878_v46 }
  0x32   :  { %1801 = vmatmul.mubr.bf16.gmra.mxu1 %v1853_v34 }
  0x33   :  { %1804 = vmatprep.mubr.bf16.mxu1 %v1856_v35  ;;  %617 = vmatpush1.bf16.msra.mxu1 %v1876_v47 }
  0x34   :  { %618 = vmatprep.subr.bf16.mxu1 %v1881_v48 }
  0x37   :  { %619 = vmatpush1.bf16.msra.mxu1 %v1879_v49 }
  0x38   :  { %620 = vmatprep.subr.bf16.mxu1 %v1884_v50 }
  0x3a   :  { %1805 = vmatmul.mubr.bf16.gmra.mxu1 %v1857_v37 }
  0x3b   :  { %640 = vmatprep.mubr.bf16.mxu1 %v2028_v1  ;;  %621 = vmatpush1.bf16.msra.mxu1 %v1882_v51 }
  0x3c   :  { %622 = vmatprep.subr.bf16.mxu1 %v1887_v53 }
  0x3f   :  { %623 = vmatpush1.bf16.msra.mxu1 %v1885_v52 }
  0x40   :  { %1086 = vmatprep.subr.bf16.mxu1 %v1890_v54 }
  0xe2   :  { %v1794_v55 = vpop.f32.mrf.mxu1 }
  0xe3   :  { %v282_v56 = vmul.f32 0.044715, %v1794_v55  ;;  %v266_v48 = vmul.f32 0.5, %v1794_v55 }
  0xe4   :  { %v2255_v57 = vpop.f32.mrf.mxu1  ;;  %v2293_v31 = vpop.f32.mrf.mxu0 }
  0xe5   :  { %v298_v58 = vmul.f32 %v1794_v55, %v282_v56  ;;  %v280_v59 = vmul.f32 0.044715, %v2255_v57  ;;  %v264_v52 = vmul.f32 0.5, %v2255_v57  ;;  %v2317_v56 = vpop.permute.xlu0 %833 }
  0xe6   :  { %v2258_v60 = vpop.f32.mrf.mxu1  ;;  %v2307_v44 = vpop.f32.mrf.mxu0 }
  0xe7   :  { %v314_v61 = vmul.f32 %v1794_v55, %v298_v58  ;;  %v296_v62 = vmul.f32 %v280_v59, %v2255_v57  ;;  %v283_v63 = vmul.f32 0.044715, %v2258_v60  ;;  %v267_v59 = vmul.f32 0.5, %v2258_v60 }
  0xe8   :  { %v2262_v0 = vpop.f32.mrf.mxu1 }
  0xe9   :  { %v330_v2 = vadd.f32 %v1794_v55, %v314_v61  ;;  %v312_v3 = vmul.f32 %v296_v62, %v2255_v57  ;;  %v299_v4 = vmul.f32 %v2258_v60, %v283_v63  ;;  %v281_v5 = vmul.f32 0.044715, %v2262_v0 }
  0xea   :  { %v2267_v6 = vpop.f32.mrf.mxu1 }
  0xeb   :  { %v346_v7 = vmul.f32 0.7978846, %v330_v2  ;;  %v328_v8 = vadd.f32 %v312_v3, %v2255_v57  ;;  %v315_v9 = vmul.f32 %v2258_v60, %v299_v4  ;;  %v297_v10 = vmul.f32 %v281_v5, %v2262_v0  ;;  %v2325_v2 = vpop.f32.mrf.mxu0 }
  0xec   :  { %v286_v11 = vmul.f32 0.044715, %v2267_v6  ;;  %v2273_v12 = vpop.f32.mrf.mxu1  ;;  %v265_v3 = vmul.f32 0.5, %v2262_v0 }
  0xed   :  { %1960 = vtanh.f32 %v346_v7  ;;  %v344_v13 = vmul.f32 0.7978846, %v328_v8  ;;  %v331_v14 = vadd.f32 %v2258_v60, %v315_v9  ;;  %v313_v15 = vmul.f32 %v297_v10, %v2262_v0 }
  0xee   :  { %v302_v16 = vmul.f32 %v2267_v6, %v286_v11  ;;  %v284_v17 = vmul.f32 0.044715, %v2273_v12  ;;  %v2279_v18 = vpop.f32.mrf.mxu1 }
  0xef   :  { %1962 = vtanh.f32 %v344_v13  ;;  %v347_v19 = vmul.f32 0.7978846, %v331_v14  ;;  %v287_v20 = vmul.f32 0.044715, %v2279_v18  ;;  %v329_v21 = vadd.f32 %v313_v15, %v2262_v0 }
  0xf0   :  { %v318_v22 = vmul.f32 %v2267_v6, %v302_v16  ;;  %v300_v23 = vmul.f32 %v284_v17, %v2273_v12  ;;  %v2285_v24 = vpop.f32.mrf.mxu1  ;;  %v270_v13 = vmul.f32 0.5, %v2267_v6  ;;  %v2336_v14 = vmul.f32 0.5, %v2273_v12 }
  0xf1   :  { %1964 = vtanh.f32 %v347_v19  ;;  %v303_v25 = vmul.f32 %v2279_v18, %v287_v20  ;;  %v285_v26 = vmul.f32 0.044715, %v2285_v24  ;;  %v345_v27 = vmul.f32 0.7978846, %v329_v21  ;;  %v782_v21 = vpop.f32.mrf.mxu0 }
  0xf2   :  { %v334_v28 = vadd.f32 %v2267_v6, %v318_v22  ;;  %v316_v29 = vmul.f32 %v300_v23, %v2273_v12  ;;  %v2291_v30 = vpop.f32.mrf.mxu1 }
  0xf3   :  { %v319_v32 = vmul.f32 %v2279_v18, %v303_v25  ;;  %v301_v33 = vmul.f32 %v285_v26, %v2285_v24  ;;  %v290_v34 = vmul.f32 0.044715, %v2291_v30  ;;  %1966 = vtanh.f32 %v345_v27 }
  0xf4   :  { %v350_v35 = vmul.f32 0.7978846, %v334_v28  ;;  %v332_v36 = vadd.f32 %v316_v29, %v2273_v12  ;;  %v2299_v37 = vpop.f32.mrf.mxu1  ;;  %v2348_v28 = vpop.permute.xlu0 %838 }
  0xf5   :  { %v335_v38 = vadd.f32 %v2279_v18, %v319_v32  ;;  %v317_v39 = vmul.f32 %v301_v33, %v2285_v24  ;;  %v306_v40 = vmul.f32 %v2291_v30, %v290_v34  ;;  %v288_v42 = vmul.f32 0.044715, %v2299_v37 }
  0xf6   :  { %1968 = vtanh.f32 %v350_v35  ;;  %v348_v41 = vmul.f32 0.7978846, %v332_v36  ;;  %v2305_v43 = vpop.f32.mrf.mxu1 }
  0xf7   :  { %v351_v45 = vmul.f32 0.7978846, %v335_v38  ;;  %v333_v46 = vadd.f32 %v317_v39, %v2285_v24  ;;  %v322_v47 = vmul.f32 %v2291_v30, %v306_v40  ;;  %v304_v49 = vmul.f32 %v288_v42, %v2299_v37 }
  0xf8   :  { %1970 = vtanh.f32 %v348_v41  ;;  %v291_v50 = vmul.f32 0.044715, %v2305_v43  ;;  %v2313_v51 = vpop.f32.mrf.mxu1 }
  0xf9   :  { %1972 = vtanh.f32 %v351_v45  ;;  %v349_v53 = vmul.f32 0.7978846, %v333_v46  ;;  %v338_v54 = vadd.f32 %v2291_v30, %v322_v47  ;;  %v320_v55 = vmul.f32 %v304_v49, %v2299_v37 }
  0xfa   :  { %v1961_v58 = vpop.eup %1960  ;;  %v307_v61 = vmul.f32 %v2305_v43, %v291_v50  ;;  %v289_v62 = vmul.f32 0.044715, %v2313_v51  ;;  %v2323_v63 = vpop.f32.mrf.mxu1 }
  0xfb   :  { %v378_v57 = vadd.f32 1.0, %v1961_v58  ;;  %1974 = vtanh.f32 %v349_v53  ;;  %v354_v4 = vmul.f32 0.7978846, %v338_v54  ;;  %v336_v7 = vadd.f32 %v320_v55, %v2299_v37 }
  0xfc   :  { %v1963_v5 = vpop.eup %1962  ;;  %v323_v60 = vmul.f32 %v2305_v43, %v307_v61  ;;  %v305_v8 = vmul.f32 %v289_v62, %v2313_v51  ;;  %v294_v9 = vmul.f32 0.044715, %v2323_v63  ;;  %v2332_v10 = vpop.f32.mrf.mxu1  ;;  %v271_v62 = vmul.f32 0.5, %v2279_v18 }
  0xfd   :  { %v376_v11 = vadd.f32 1.0, %v1963_v5  ;;  %1976 = vtanh.f32 %v354_v4  ;;  %v352_v15 = vmul.f32 0.7978846, %v336_v7  ;;  %v394_v22 = vmul.f32 %v378_v57, %v266_v48  ;;  %v2361_v57 = vpop.f32.mrf.mxu0 }
  0xfe   :  { %v1965_v0 = vpop.eup %1964  ;;  %v339_v16 = vadd.f32 %v2305_v43, %v323_v60  ;;  %v321_v17 = vmul.f32 %v305_v8, %v2313_v51  ;;  %v310_v19 = vmul.f32 %v2323_v63, %v294_v9  ;;  %v2341_v20 = vpop.f32.mrf.mxu1  ;;  %v292_v25 = vmul.f32 0.044715, %v2332_v10 }
  0xff   :  { %v379_v23 = vadd.f32 1.0, %v1965_v0  ;;  %1978 = vtanh.f32 %v782_v21  ;;  %v392_v32 = vmul.f32 %v376_v11, %v264_v52  ;;  %v295_v35 = vmul.f32 0.044715, %v2341_v20 }
 0x100   :  { %1980 = vtanh.f32 %v352_v15  ;;  %v355_v6 = vmul.f32 0.7978846, %v339_v16  ;;  %v337_v12 = vadd.f32 %v321_v17, %v2313_v51  ;;  %v326_v26 = vmul.f32 %v2323_v63, %v310_v19  ;;  %v2346_v27 = vpop.f32.mrf.mxu1  ;;  %v1967_v29 = vpop.eup %1966 }
 0x101   :  { %v395_v33 = vmul.f32 %v379_v23, %v267_v59  ;;  %v308_v34 = vmul.f32 %v292_v25, %v2332_v10  ;;  %v377_v36 = vadd.f32 1.0, %v1967_v29  ;;  %v311_v45 = vmul.f32 %v2341_v20, %v295_v35 }
 0x102   :  { %1982 = vtanh.f32 %v355_v6  ;;  %v353_v38 = vmul.f32 0.7978846, %v337_v12  ;;  %v342_v39 = vadd.f32 %v2323_v63, %v326_v26  ;;  %v293_v46 = vmul.f32 0.044715, %v2346_v27 }
 0x103   :  { %v1969_v40 = vpop.eup %1968  ;;  %v415_v41 = vadd.f32 %v395_v33, %v394_v22  ;;  %v324_v42 = vmul.f32 %v308_v34, %v2332_v10  ;;  %v393_v47 = vmul.f32 %v377_v36, %v265_v3  ;;  %v327_v54 = vmul.f32 %v2341_v20, %v311_v45  ;;  %v2363_v3 = vpop.permute.xlu0 %848 }
 0x104   :  { %v382_v48 = vadd.f32 1.0, %v1969_v40  ;;  %1984 = vtanh.f32 %v353_v38  ;;  %v358_v49 = vmul.f32 0.7978846, %v342_v39  ;;  %v309_v58 = vmul.f32 %v293_v46, %v2346_v27  ;;  %v795_v22 = vpop.f32.mrf.mxu0 }
 0x105   :  { %v1971_v50 = vpop.eup %1970  ;;  %v416_v52 = vrot.slane %v415_v41, 4  ;;  %v340_v53 = vadd.f32 %v324_v42, %v2332_v10  ;;  %v408_v55 = vadd.f32 %v393_v47, %v392_v32  ;;  %1986 = vtanh.f32 %v2307_v44 }
 0x106   :  { %v1973_v59 = vpop.eup %1972  ;;  %v380_v61 = vadd.f32 1.0, %v1971_v50  ;;  %v343_v60 = vadd.f32 %v2341_v20, %v327_v54  ;;  %v398_v9 = vmul.f32 %v382_v48, %v270_v13  ;;  %v269_v11 = vmul.f32 0.5, %v2285_v24  ;;  %v1831_v35 = vpop.f32.mrf.mxu0 }
 0x107   :  { %v417_v4 = vadd.f32 %v416_v52, %v415_v41  ;;  %v383_v5 = vadd.f32 1.0, %v1973_v59  ;;  %v356_v7 = vmul.f32 0.7978846, %v340_v53  ;;  %1988 = vtanh.f32 %v358_v49  ;;  %v2371_v12 = vpop.permute.xlu0 %858 }
 0x108   :  { %v1975_v8 = vpop.eup %1974  ;;  %v325_v0 = vmul.f32 %v309_v58, %v2346_v27  ;;  %v409_v15 = vrot.slane %v408_v55, 4  ;;  %v359_v19 = vmul.f32 0.7978846, %v343_v60  ;;  %v396_v23 = vmul.f32 %v380_v61, %v2336_v14  ;;  %v798_v54 = vpop.f32.mrf.mxu0 }
 0x109   :  { %v399_v18 = vmul.f32 %v383_v5, %v271_v62  ;;  %v381_v16 = vadd.f32 1.0, %v1975_v8  ;;  %1990 = vtanh.f32 %v356_v7  ;;  %v418_v17 = vrot.slane %v417_v4, 2 }
 0x10a   :  { %v1977_v44 = vpop.eup %1976  ;;  %v341_v21 = vadd.f32 %v325_v0, %v2346_v27  ;;  %1992 = vtanh.f32 %v2293_v31  ;;  %v410_v29 = vadd.f32 %v409_v15, %v408_v55  ;;  %v274_v14 = vmul.f32 0.5, %v2291_v30 }
 0x10b   :  { %v429_v25 = vadd.f32 %v399_v18, %v398_v9  ;;  %v397_v6 = vmul.f32 %v381_v16, %v269_v11  ;;  %1994 = vtanh.f32 %v359_v19  ;;  %v419_v33 = vadd.f32 %v418_v17, %v417_v4  ;;  %v2377_v45 = vpop.permute.xlu0 %925  ;;  %v829_v4 = vpop.permute.xlu1 %828 }
 0x10c   :  { %v1979_v24 = vpop.eup %1978  ;;  %v357_v13 = vmul.f32 0.7978846, %v341_v21  ;;  %v386_v34 = vadd.f32 1.0, %v1977_v44  ;;  %v272_v31 = vmul.f32 0.5, %v2299_v37  ;;  %v275_v41 = vmul.f32 0.5, %v2305_v43 }
 0x10d   :  { %v1981_v26 = vpop.eup %1980  ;;  %v422_v32 = vadd.f32 %v397_v6, %v396_v23  ;;  %v430_v38 = vrot.slane %v429_v25, 4  ;;  %v411_v47 = vrot.slane %v410_v29, 2  ;;  %v273_v49 = vmul.f32 0.5, %v2313_v51 }
 0x10e   :  { %1996 = vtanh.f32 %v357_v13  ;;  %v384_v40 = vadd.f32 1.0, %v1981_v26  ;;  %v420_v50 = vrot.slane %v419_v33, 1  ;;  %v402_v52 = vmul.f32 %v386_v34, %v274_v14 }
 0x10f   :  { %v1983_v36 = vpop.eup %1982  ;;  %v423_v39 = vrot.slane %v422_v32, 4  ;;  %1998 = vtanh.f32 %v2325_v2  ;;  %v431_v58 = vadd.f32 %v430_v38, %v429_v25  ;;  %v867_v37 = vmul.f32 %v1979_v24, %v2317_v56  ;;  %v844_v26 = vpop.permute.xlu1 %843 }
 0x110   :  { %v387_v42 = vadd.f32 1.0, %v1983_v36  ;;  %2000 = vtanh.f32 %v795_v22  ;;  %v927_v43 = vrot.slane %v2377_v45, 1  ;;  %v400_v59 = vmul.f32 %v384_v40, %v272_v31 }
 0x111   :  { %v1985_v46 = vpop.eup %1984  ;;  %v424_v48 = vadd.f32 %v423_v39, %v422_v32  ;;  %v278_v62 = vmul.f32 0.5, %v2323_v63  ;;  %v412_v51 = vadd.f32 %v411_v47, %v410_v29  ;;  %v276_v60 = vmul.f32 0.5, %v2332_v10 }
 0x112   :  { %v403_v53 = vmul.f32 %v387_v42, %v275_v41  ;;  %v385_v30 = vadd.f32 1.0, %v1985_v46  ;;  %v1987_v2 = vpop.eup %1986  ;;  %2002 = vtanh.f32 %v798_v54  ;;  %v421_v9 = vadd.f32 %v420_v50, %v419_v33 }
 0x113   :  { %v425_v7 = vrot.slane %v424_v48, 2  ;;  %v279_v56 = vmul.f32 0.5, %v2341_v20  ;;  %v432_v15 = vrot.slane %v431_v58, 2  ;;  %v277_v18 = vmul.f32 0.5, %v2346_v27 }
 0x114   :  { %v443_v55 = vadd.f32 %v403_v53, %v402_v52  ;;  %v401_v61 = vmul.f32 %v385_v30, %v273_v49  ;;  %v1989_v5 = vpop.eup %1988  ;;  %v880_v16 = vrot.slane %v867_v37, 4  ;;  %v866_v44 = vmul.f32 %v1987_v2, %v829_v4 }
 0x115   :  { %v390_v21 = vadd.f32 1.0, %v1989_v5  ;;  %2004 = vtanh.f32 %v2361_v57  ;;  %v413_v10 = vrot.slane %v412_v51, 1  ;;  %v426_v23 = vadd.f32 %v425_v7, %v424_v48 }
 0x116   :  { %v1991_v8 = vpop.eup %1990  ;;  %v444_v11 = vrot.slane %v443_v55, 4  ;;  %v436_v0 = vadd.f32 %v401_v61, %v400_v59  ;;  %2006 = vtanh.f32 %v1831_v35  ;;  %v465_v6 = vmul.f32 0.0625, %v421_v9 }
 0x117   :  { %v1993_v17 = vpop.eup %1992  ;;  %v388_v25 = vadd.f32 1.0, %v1991_v8  ;;  %v433_v27 = vadd.f32 %v432_v15, %v431_v58  ;;  %v881_v32 = vadd.f32 %v880_v16, %v867_v37  ;;  %v874_v33 = vrot.slane %v866_v44, 4  ;;  %v854_v37 = vpop.permute.xlu1 %853 }
 0x118   :  { %v445_v63 = vadd.f32 %v444_v11, %v443_v55  ;;  %v437_v19 = vrot.slane %v436_v0, 4  ;;  %v1995_v22 = vpop.eup %1994  ;;  %v868_v34 = vmul.f32 %v1993_v17, %v2348_v28  ;;  %v406_v39 = vmul.f32 %v390_v21, %v278_v62 }
 0x119   :  { %v391_v20 = vadd.f32 1.0, %v1995_v22  ;;  %v414_v31 = vadd.f32 %v413_v10, %v412_v51  ;;  %v427_v40 = vrot.slane %v426_v23, 1  ;;  %v404_v35 = vmul.f32 %v388_v25, %v276_v60 }
 0x11a   :  { %v446_v24 = vrot.slane %v445_v63, 2  ;;  %v438_v13 = vadd.f32 %v437_v19, %v436_v0  ;;  %v886_v49 = vrot.slane %v868_v34, 4  ;;  %v473_v50 = vpack.c.bf16 %v465_v6, %v465_v6 }
 0x11b   :  { %v1997_v29 = vpop.eup %1996  ;;  %v407_v57 = vmul.f32 %v391_v20, %v279_v56  ;;  %v434_v52 = vrot.slane %v433_v27, 1  ;;  %v875_v53 = vadd.f32 %v874_v33, %v866_v44  ;;  %v882_v58 = vrot.slane %v881_v32, 2  ;;  %v864_v6 = vpop.permute.xlu1 %863 }
 0x11c   :  { %v1999_v36 = vpop.eup %1998  ;;  %v439_v38 = vrot.slane %v438_v13, 2  ;;  %v389_v14 = vadd.f32 1.0, %v1997_v29  ;;  %v447_v41 = vadd.f32 %v446_v24, %v445_v63  ;;  %v464_v59 = vmul.f32 0.0625, %v414_v31 }
 0x11d   :  { %v2001_v42 = vpop.eup %2000  ;;  %v457_v47 = vadd.f32 %v407_v57, %v406_v39  ;;  %v869_v30 = vmul.f32 %v1999_v36, %v844_v26  ;;  %v428_v55 = vadd.f32 %v427_v40, %v426_v23  ;;  %v887_v60 = vadd.f32 %v886_v49, %v868_v34 }
 0x11e   :  { %v440_v46 = vadd.f32 %v439_v38, %v438_v13  ;;  %v405_v48 = vmul.f32 %v389_v14, %v277_v18  ;;  %v870_v62 = vmul.f32 %v2001_v42, %v2363_v3  ;;  %v448_v5 = vrot.slane %v447_v41, 1 }
 0x11f   :  { %v458_v28 = vrot.slane %v457_v47, 4  ;;  %v892_v61 = vrot.slane %v869_v30, 4  ;;  %v2003_v4 = vpop.eup %2002  ;;  %v505_v8 = vunpack.c.l.b16 %v473_v50  ;;  %v435_v9 = vadd.f32 %v434_v52, %v433_v27 }
 0x120   :  { %v441_v54 = vrot.slane %v440_v46, 1  ;;  %v450_v2 = vadd.f32 %v405_v48, %v404_v35  ;;  %v876_v11 = vrot.slane %v875_v53, 2  ;;  %v928_v0 = vrot.slane %v2377_v45, 2 }
 0x121   :  { %v459_v51 = vadd.f32 %v458_v28, %v457_v47  ;;  %v898_v16 = vrot.slane %v870_v62, 4  ;;  %v466_v17 = vmul.f32 0.0625, %v428_v55  ;;  %v883_v63 = vadd.f32 %v882_v58, %v881_v32 }
 0x122   :  { %v451_v7 = vrot.slane %v450_v2, 4  ;;  %v442_v56 = vadd.f32 %v441_v54, %v440_v46  ;;  %v2005_v44 = vpop.eup %2004  ;;  %v893_v19 = vadd.f32 %v892_v61, %v869_v30  ;;  %v871_v3 = vmul.f32 %v2003_v4, %v854_v37 }
 0x123   :  { %v460_v15 = vrot.slane %v459_v51, 2  ;;  %v2007_v21 = vpop.eup %2006  ;;  %v472_v22 = vpack.c.bf16 %v464_v59, %v464_v59  ;;  %v449_v10 = vadd.f32 %v448_v5, %v447_v41  ;;  %v888_v25 = vrot.slane %v887_v60, 2 }
 0x124   :  { %v452_v18 = vadd.f32 %v451_v7, %v450_v2  ;;  %v467_v24 = vmul.f32 0.0625, %v435_v9  ;;  %v877_v20 = vadd.f32 %v876_v11, %v875_v53  ;;  %v904_v26 = vrot.slane %v871_v3, 4 }
 0x125   :  { %v461_v13 = vadd.f32 %v460_v15, %v459_v51  ;;  %v468_v29 = vmul.f32 0.0625, %v442_v56  ;;  %v899_v33 = vadd.f32 %v898_v16, %v870_v62  ;;  %v872_v34 = vmul.f32 %v2005_v44, %v2371_v12 }
 0x126   :  { %v453_v23 = vrot.slane %v452_v18, 2  ;;  %v474_v32 = vpack.c.bf16 %v466_v17, %v466_v17  ;;  %v884_v36 = vrot.slane %v883_v63, 1  ;;  %v894_v38 = vrot.slane %v893_v19, 2 }
 0x127   :  { %v873_v39 = vmul.f32 %v2007_v21, %v864_v6  ;;  %v469_v57 = vmul.f32 0.0625, %v449_v10  ;;  %v889_v31 = vadd.f32 %v888_v25, %v887_v60  ;;  %v910_v40 = vrot.slane %v872_v34, 4 }
 0x128   :  { %v454_v27 = vadd.f32 %v453_v23, %v452_v18  ;;  %v504_v41 = vunpack.c.l.b16 %v472_v22  ;;  %v475_v35 = vpack.c.bf16 %v467_v24, %v467_v24  ;;  %v462_v42 = vrot.slane %v461_v13, 1 }
 0x129   :  { %v905_v46 = vadd.f32 %v904_v26, %v871_v3  ;;  %v476_v47 = vpack.c.bf16 %v468_v29, %v468_v29  ;;  %v878_v49 = vrot.slane %v877_v20, 1  ;;  %v900_v12 = vrot.slane %v899_v33, 2  ;;  %v1888_v29 = vld [vmem:[%s2596_s7 + $0x70] ss:$8 sps:$4 sm:$0xff]  }
 0x12a   :  { %v455_v14 = vrot.slane %v454_v27, 1  ;;  %v506_v50 = vunpack.c.l.b16 %v474_v32  ;;  %v885_v52 = vadd.f32 %v884_v36, %v883_v63  ;;  %v895_v53 = vadd.f32 %v894_v38, %v893_v19 }
 0x12b   :  { %v916_v30 = vrot.slane %v873_v39, 4  ;;  %v477_v54 = vpack.c.bf16 %v469_v57, %v469_v57  ;;  %v890_v2 = vrot.slane %v889_v31, 1  ;;  %v911_v58 = vadd.f32 %v910_v40, %v872_v34 }
 0x12c   :  { %v456_v48 = vadd.f32 %v455_v14, %v454_v27  ;;  %v513_v37 = vsel %vm512_vm0, %v505_v8, %v504_v41  ;;  %v507_v59 = vunpack.c.l.b16 %v475_v35  ;;  %v906_v55 = vrot.slane %v905_v46, 2  ;;  %v1891_v35 = vld [vmem:[%s2596_s7 + $0x60] ss:$8 sps:$4 sm:$0xff]  }
 0x12d   :  { %v463_v61 = vadd.f32 %v462_v42, %v461_v13  ;;  %v508_v62 = vunpack.c.l.b16 %v476_v47  ;;  %v879_v4 = vadd.f32 %v878_v49, %v877_v20  ;;  %v901_v5 = vadd.f32 %v900_v12, %v899_v33  ;;  %v1896_v42 = vld [vmem:[%s2596_s7 + $0x54] ss:$8 sps:$4 sm:$0xff]  }
 0x12e   :  { %v470_v28 = vmul.f32 0.0625, %v456_v48  ;;  %v896_v7 = vrot.slane %v895_v53, 1  ;;  %v917_v60 = vadd.f32 %v916_v30, %v873_v39  ;;  %v515_v11 = vsel %vm514_vm1, %v506_v50, %v513_v37  ;;  %v1894_v30 = vld [vmem:[%s2596_s7 + $0x50] ss:$8 sps:$4 sm:$0xff]  }
 0x12f   :  { %v471_v9 = vmul.f32 0.0625, %v463_v61  ;;  %v509_v56 = vunpack.c.l.b16 %v477_v54  ;;  %v891_v15 = vadd.f32 %v890_v2, %v889_v31  ;;  %v912_v18 = vrot.slane %v911_v58, 2  ;;  %v1899_v54 = vld [vmem:[%s2596_s7 + $0x44] ss:$8 sps:$4 sm:$0xff]   ;;  %v1897_v61 = vld [vmem:[%s2596_s7 + $0x40] ss:$8 sps:$4 sm:$0xff]  }
 0x130   :  { %v478_v51 = vpack.c.bf16 %v470_v28, %v470_v28  ;;  %v907_v44 = vadd.f32 %v906_v55, %v905_v46  ;;  %v943_v8 = vmul.f32 %v927_v43, %v885_v52  ;;  %v517_v63 = vsel %vm516_vm2, %v507_v59, %v515_v11  ;;  %v1900_v11 = vld [vmem:[%s2596_s7 + $0x30] ss:$8 sps:$4 sm:$0xff]  }
 0x131   :  { %v479_v17 = vpack.c.bf16 %v471_v9, %v471_v9  ;;  %v902_v19 = vrot.slane %v901_v5, 1  ;;  %v929_v3 = vrot.slane %v2377_v45, 3  ;;  %v519_v21 = vsel %vm518_vm3, %v508_v62, %v517_v63 }
 0x132   :  { %v510_v16 = vunpack.c.l.b16 %v478_v51  ;;  %v897_v22 = vadd.f32 %v896_v7, %v895_v53  ;;  %v918_v10 = vrot.slane %v917_v60, 2  ;;  %v521_v25 = vsel %vm520_vm4, %v509_v56, %v519_v21 }
 0x133   :  { %v511_v23 = vunpack.c.l.b16 %v479_v17  ;;  %v913_v6 = vadd.f32 %v912_v18, %v911_v58  ;;  %v944_v24 = vmul.f32 %v928_v0, %v891_v15  ;;  %v908_v13 = vrot.slane %v907_v44, 1  ;;  %v1893_v0 = vld [vmem:[%s2596_s7 + $0x64] ss:$8 sps:$4 sm:$0xff]   ;;  %v1903_v17 = vld [vmem:[%s2596_s7 + $0x20] ss:$8 sps:$4 sm:$0xff]  }
 0x134   :  { %v523_v43 = vsel %vm522_vm5, %v510_v16, %v521_v25  ;;  %v942_v20 = vmul.f32 %v2377_v45, %v879_v4  ;;  %v951_v26 = vpack.c.bf16 %v943_v8, %v943_v8  ;;  %v903_v33 = vadd.f32 %v902_v19, %v901_v5  ;;  %v1902_v5 = vld [vmem:[%s2596_s7 + $0x34] ss:$8 sps:$4 sm:$0xff]   ;;  %v1905_v15 = vld [vmem:[%s2596_s7 + $0x24] ss:$8 sps:$4 sm:$0xff]  }
 0x135   :  { %v525_v27 = vsel %vm524_vm6, %v511_v23, %v523_v43  ;;  %v930_v34 = vrot.slane %v2377_v45, 4  ;;  %v919_v36 = vadd.f32 %v918_v10, %v917_v60  ;;  %v945_v38 = vmul.f32 %v929_v3, %v897_v22  ;;  %v1908_v19 = vld [vmem:[%s2596_s7 + $0x14] ss:$8 sps:$4 sm:$0xff]   ;;  %v1906_v10 = vld [vmem:[%s2596_s7 + $0x10] ss:$8 sps:$4 sm:$0xff]  }
 0x136   :  { %v526_v32 = vpack.c.b16 %v525_v27, %v525_v27  ;;  %v914_v39 = vrot.slane %v913_v6, 1  ;;  %v952_v57 = vpack.c.bf16 %v944_v24, %v944_v24  ;;  %v909_v14 = vadd.f32 %v908_v13, %v907_v44  ;;  %v1911_v25 = vld [vmem:[%s2596_s7 + $0x4] ss:$8 sps:$4 sm:$0xff]   ;;  %v1909_v43 = vld [vmem:[%s2596_s7] ss:$8 sps:$4 sm:$0xff]  }
 0x137   :  { %v931_v31 = vrot.slane %v2377_v45, 5  ;;  %v950_v40 = vpack.c.bf16 %v942_v20, %v942_v20  ;;  %v983_v41 = vunpack.c.l.b16 %v951_v26  ;;  %v946_v46 = vmul.f32 %v930_v34, %v903_v33  ;;  %v1912_v26 = vld [vmem:[%s2597_s8 + $0x70] ss:$8 sps:$4 sm:$0xff]   ;;  %v1917_v27 = vld [vmem:[%s2597_s8 + $0x64] ss:$8 sps:$4 sm:$0xff]  }
 0x138   :  { %641 = vmatmul.mubr.bf16.vlgmr.msra.gmra.mxu1 %v526_v32  ;;  %v920_v47 = vrot.slane %v919_v36, 1  ;;  %v953_v48 = vpack.c.bf16 %v945_v38, %v945_v38  ;;  %v915_v49 = vadd.f32 %v914_v39, %v913_v6  ;;  %v984_v12 = vunpack.c.l.b16 %v952_v57  ;;  %v1915_v33 = vld [vmem:[%s2597_s8 + $0x60] ss:$8 sps:$4 sm:$0xff]   ;;  %v1920_v34 = vld [vmem:[%s2597_s8 + $0x54] ss:$8 sps:$4 sm:$0xff]  }
 0x139   :  { %1087 = vmatpush1.bf16.msra.mxu1 %v1888_v29  ;;  %1118 = vmatprep.mubr.bf16.mxu1 %v2028_v1  ;;  %v932_v50 = vrot.slane %v2377_v45, 6  ;;  %v982_v52 = vunpack.c.l.b16 %v950_v40  ;;  %v990_v53 = vrot.slane %v983_v41, 7  ;;  %v947_v1 = vmul.f32 %v931_v31, %v909_v14  ;;  %v1914_v29 = vld [vmem:[%s2597_s8 + $0x74] ss:$8 sps:$4 sm:$0xff]   ;;  %v1918_v32 = vld [vmem:[%s2597_s8 + $0x50] ss:$8 sps:$4 sm:$0xff]  }
 0x13a   :  { %1088 = vmatprep.subr.bf16.mxu1 %v1893_v0  ;;  %v954_v28 = vpack.c.bf16 %v946_v46, %v946_v46  ;;  %v921_v2 = vadd.f32 %v920_v47, %v919_v36  ;;  %v933_v58 = vrot.slane %v2377_v45, 7  ;;  %v985_v37 = vunpack.c.l.b16 %v953_v48  ;;  %1339 = vmatprep.subr.bf16.mxu0 %v1914_v29  ;;  %v1923_v0 = vld [vmem:[%s2597_s8 + $0x44] ss:$8 sps:$4 sm:$0xff]   ;;  %v1921_v36 = vld [vmem:[%s2597_s8 + $0x40] ss:$8 sps:$4 sm:$0xff]  }
 0x13b   :  { %v992_v59 = vrot.slane %v984_v12, 6  ;;  %v948_v55 = vmul.f32 %v932_v50, %v915_v49  ;;  %v955_v62 = vpack.c.bf16 %v947_v1, %v947_v1  ;;  %v991_v4 = vsel %vm512_vm0, %v990_v53, %v982_v52  ;;  %1340 = vmatpush1.bf16.msra.mxu0 %v1912_v26  ;;  %v1926_v38 = vld [vmem:[%s2597_s8 + $0x34] ss:$8 sps:$4 sm:$0xff]   ;;  %v1924_v39 = vld [vmem:[%s2597_s8 + $0x30] ss:$8 sps:$4 sm:$0xff]  }
 0x13c   :  { %v986_v51 = vunpack.c.l.b16 %v954_v28  ;;  %v949_v7 = vmul.f32 %v933_v58, %v921_v2  ;;  %v994_v60 = vrot.slane %v985_v37, 5  ;;  %1341 = vmatprep.subr.bf16.mxu0 %v1917_v27  ;;  %v1929_v57 = vld [vmem:[%s2597_s8 + $0x24] ss:$8 sps:$4 sm:$0xff]   ;;  %v1927_v14 = vld [vmem:[%s2597_s8 + $0x20] ss:$8 sps:$4 sm:$0xff]  }
 0x13d   :  { %1089 = vmatpush1.bf16.msra.mxu1 %v1891_v35  ;;  %v956_v45 = vpack.c.bf16 %v948_v55, %v948_v55  ;;  %v993_v9 = vsel %vm514_vm1, %v992_v59, %v991_v4  ;;  %v987_v56 = vunpack.c.l.b16 %v955_v62  ;;  %v1932_v31 = vld [vmem:[%s2597_s8 + $0x14] ss:$8 sps:$4 sm:$0xff]   ;;  %v1930_v40 = vld [vmem:[%s2597_s8 + $0x10] ss:$8 sps:$4 sm:$0xff]   ;;  %v1935_v41 = vld [vmem:[%s2597_s8 + $0x4] ss:$8 sps:$4 sm:$0xff]  }
 0x13e   :  { %1090 = vmatprep.subr.bf16.mxu1 %v1896_v42  ;;  %v996_v18 = vrot.slane %v986_v51, 4  ;;  %v957_v16 = vpack.c.bf16 %v949_v7, %v949_v7  ;;  %v995_v44 = vsel %vm516_vm2, %v994_v60, %v993_v9  ;;  %v1933_v35 = vld [vmem:[%s2597_s8] ss:$8 sps:$4 sm:$0xff]   ;;  %v1936_v42 = vld [vmem:[%s2597_s8 + $0xf0] ss:$8 sps:$4 sm:$0xff]  }
 0x13f   :  { %v988_v8 = vunpack.c.l.b16 %v956_v45  ;;  %v998_v63 = vrot.slane %v987_v56, 3  ;;  %1342 = vmatpush1.bf16.msra.mxu0 %v1915_v33  ;;  %v1938_v46 = vld [vmem:[%s2597_s8 + $0xf4] ss:$8 sps:$4 sm:$0xff]   ;;  %v1941_v47 = vld [vmem:[%s2597_s8 + $0xe4] ss:$8 sps:$4 sm:$0xff]  }
 0x140   :  { %v997_v3 = vsel %vm518_vm3, %v996_v18, %v995_v44  ;;  %v989_v21 = vunpack.c.l.b16 %v957_v16  ;;  %1343 = vmatprep.subr.bf16.mxu0 %v1920_v34  ;;  %v1939_v48 = vld [vmem:[%s2597_s8 + $0xe0] ss:$8 sps:$4 sm:$0xff]   ;;  %v1944_v49 = vld [vmem:[%s2597_s8 + $0xd4] ss:$8 sps:$4 sm:$0xff]   ;;  %v1942_v12 = vld [vmem:[%s2597_s8 + $0xd0] ss:$8 sps:$4 sm:$0xff]  }
 0x141   :  { %1091 = vmatpush1.bf16.msra.mxu1 %v1894_v30  ;;  %v1000_v22 = vrot.slane %v988_v8, 2  ;;  %v999_v23 = vsel %vm520_vm4, %v998_v63, %v997_v3  ;;  %v1947_v50 = vld [vmem:[%s2597_s8 + $0xc4] ss:$8 sps:$4 sm:$0xff]   ;;  %v1945_v52 = vld [vmem:[%s2597_s8 + $0xc0] ss:$8 sps:$4 sm:$0xff]  }
 0x142   :  { %1092 = vmatprep.subr.bf16.mxu1 %v1899_v54  ;;  %v1002_v6 = vrot.slane %v989_v21, 1  ;;  %v1950_v53 = vld [vmem:[%s2597_s8 + $0xb4] ss:$8 sps:$4 sm:$0xff]   ;;  %v1948_v30 = vld [vmem:[%s2597_s8 + $0xb0] ss:$8 sps:$4 sm:$0xff]  }
 0x143   :  { %v1001_v24 = vsel %vm522_vm5, %v1000_v22, %v999_v23  ;;  %1344 = vmatpush1.bf16.msra.mxu0 %v1918_v32  ;;  %v1953_v1 = vld [vmem:[%s2597_s8 + $0xa4] ss:$8 sps:$4 sm:$0xff]   ;;  %v1951_v54 = vld [vmem:[%s2597_s8 + $0xa0] ss:$8 sps:$4 sm:$0xff]   ;;  %v1956_v28 = vld [vmem:[%s2597_s8 + $0x94] ss:$8 sps:$4 sm:$0xff]  }
 0x144   :  { %v1003_v13 = vsel %vm524_vm6, %v1002_v6, %v1001_v24  ;;  %1345 = vmatprep.subr.bf16.mxu0 %v1923_v0  ;;  %v1954_v2 = vld [vmem:[%s2597_s8 + $0x90] ss:$8 sps:$4 sm:$0xff]   ;;  %v1959_v58 = vld [vmem:[%s2597_s8 + $0x84] ss:$8 sps:$4 sm:$0xff]   ;;  %v1957_v37 = vld [vmem:[%s2597_s8 + $0x80] ss:$8 sps:$4 sm:$0xff]  }
 0x145   :  { %1093 = vmatpush1.bf16.msra.mxu1 %v1897_v61  ;;  %v1004_v20 = vpack.c.b16 %v1003_v13, %v1003_v13 }
 0x146   :  { %1094 = vmatprep.subr.bf16.mxu1 %v1902_v5 }
 0x147   :  { %1346 = vmatpush1.bf16.msra.mxu0 %v1921_v36 }
 0x148   :  { %1347 = vmatprep.subr.bf16.mxu0 %v1926_v38 }
 0x149   :  { %1095 = vmatpush1.bf16.msra.mxu1 %v1900_v11 }
 0x14a   :  { %1096 = vmatprep.subr.bf16.mxu1 %v1905_v15 }
 0x14b   :  { %1348 = vmatpush1.bf16.msra.mxu0 %v1924_v39 }
 0x14c   :  { %1349 = vmatprep.subr.bf16.mxu0 %v1929_v57 }
 0x14d   :  { %1097 = vmatpush1.bf16.msra.mxu1 %v1903_v17 }
 0x14e   :  { %1098 = vmatprep.subr.bf16.mxu1 %v1908_v19 }
 0x14f   :  { %1350 = vmatpush1.bf16.msra.mxu0 %v1927_v14 }
 0x150   :  { %1351 = vmatprep.subr.bf16.mxu0 %v1932_v31 }
 0x151   :  { %1099 = vmatpush1.bf16.msra.mxu1 %v1906_v10 }
 0x152   :  { %1100 = vmatprep.subr.bf16.mxu1 %v1911_v25 }
 0x153   :  { %1352 = vmatpush1.bf16.msra.mxu0 %v1930_v40 }
 0x154   :  { %1353 = vmatprep.subr.bf16.mxu0 %v1935_v41 }
 0x155   :  { %1101 = vmatpush1.bf16.msra.mxu1 %v1909_v43 }
 0x157   :  { %1354 = vmatpush1.bf16.msra.mxu0 %v1933_v35 }
 0x158   :  { %1119 = vmatmul.mubr.bf16.vlgmr.msra.gmra.mxu1 %v1004_v20  ;;  %1355 = vmatprep.subr.bf16.mxu0 %v1938_v46 }
 0x15b   :  { %1356 = vmatpush2.bf16.msra.mxu0 %v1936_v42 }
 0x15c   :  { %1357 = vmatprep.subr.bf16.mxu0 %v1941_v47 }
 0x15f   :  { %1358 = vmatpush2.bf16.msra.mxu0 %v1939_v48 }
 0x160   :  { %1359 = vmatprep.subr.bf16.mxu0 %v1944_v49 }
 0x163   :  { %1360 = vmatpush2.bf16.msra.mxu0 %v1942_v12  ;;  %v1401_v12 = vlaneseq }
 0x164   :  { %1361 = vmatprep.subr.bf16.mxu0 %v1947_v50 }
 0x165   :  { %v2557_v50 = vshrl.u32 %v1401_v12, 7 }
 0x167   :  { %1362 = vmatpush2.bf16.msra.mxu0 %v1945_v52  ;;  %v1403_v52 = vsub.s32 0, %v2557_v50 }
 0x168   :  { %1363 = vmatprep.subr.bf16.mxu0 %v1950_v53  ;;  %v1407_v53 = vsub.s32 1, %v2557_v50 }
 0x16b   :  { %1364 = vmatpush2.bf16.msra.mxu0 %v1948_v30  ;;  %v1399_v30 = vld [vmem:[%s2598_s9] sm:$0x3] }
 0x16c   :  { %1365 = vmatprep.subr.bf16.mxu0 %v1953_v1  ;;  %v1413_v1 = vld [vmem:[%s2599_s10] sm:$0x3] }
 0x16f   :  { %1366 = vmatpush2.bf16.msra.mxu0 %v1951_v54  ;;  %v1404_v54 = vrot.slane %v1399_v30, %v1403_v52 }
 0x170   :  { %1367 = vmatprep.subr.bf16.mxu0 %v1956_v28  ;;  %v1408_v28 = vrot.slane %v1399_v30, %v1407_v53 }
 0x173   :  { %1368 = vmatpush2.bf16.msra.mxu0 %v1954_v2 }
 0x174   :  { %1369 = vmatprep.subr.bf16.mxu0 %v1959_v58 }
 0x177   :  { %1370 = vmatpush2.bf16.msra.mxu0 %v1957_v37 }
 0x1f8   :  { %v642_v59 = vpop.f32.mrf.mxu1 }
 0x1f9   :  { %v1436_v34 = vmul.f32 %v642_v59, %v642_v59 }
 0x1fa   :  { %v644_v55 = vpop.f32.mrf.mxu1 }
 0x1fb   :  { %v1437_v29 = vmul.f32 %v644_v55, %v644_v55 }
 0x1fc   :  { %v646_v61 = vpop.f32.mrf.mxu1 }
 0x1fd   :  { %v1438_v32 = vadd.f32 %v1437_v29, %v1436_v34 }
 0x1fe   :  { %v647_v62 = vpop.f32.mrf.mxu1 }
 0x218   :  { %v1120_v4 = vpop.f32.mrf.mxu1 }
 0x219   :  { %v1129_v5 = vmul.f32 0.044715, %v1120_v4  ;;  %v1127_v3 = vmul.f32 0.5, %v1120_v4 }
 0x21a   :  { %v1122_v51 = vpop.f32.mrf.mxu1 }
 0x21b   :  { %v1131_v7 = vmul.f32 %v1129_v5, %v1120_v4  ;;  %v1130_v60 = vmul.f32 0.044715, %v1122_v51  ;;  %v1128_v21 = vmul.f32 0.5, %v1122_v51 }
 0x21c   :  { %v1124_v45 = vpop.f32.mrf.mxu1 }
 0x21d   :  { %v1133_v9 = vmul.f32 %v1131_v7, %v1120_v4  ;;  %v1132_v11 = vmul.f32 %v1130_v60, %v1122_v51 }
 0x21e   :  { %v1125_v56 = vpop.f32.mrf.mxu1 }
 0x21f   :  { %v1135_v15 = vadd.f32 %v1133_v9, %v1120_v4  ;;  %v1134_v18 = vmul.f32 %v1132_v11, %v1122_v51 }
 0x221   :  { %v1137_v16 = vmul.f32 0.7978846, %v1135_v15  ;;  %v1136_v44 = vadd.f32 %v1134_v18, %v1122_v51 }
 0x223   :  { %2008 = vtanh.f32 %v1137_v16  ;;  %v1138_v8 = vmul.f32 0.7978846, %v1136_v44 }
 0x225   :  { %2010 = vtanh.f32 %v1138_v8 }
 0x230   :  { %v2009_v17 = vpop.eup %2008 }
 0x231   :  { %v1141_v63 = vadd.f32 1.0, %v2009_v17 }
 0x232   :  { %v2011_v19 = vpop.eup %2010 }
 0x233   :  { %v1142_v22 = vadd.f32 1.0, %v2011_v19  ;;  %v1143_v10 = vmul.f32 %v1141_v63, %v1127_v3 }
 0x235   :  { %v1144_v23 = vmul.f32 %v1142_v22, %v1128_v21  ;;  %v1145_v6 = vpack.c.bf16 %v1143_v10, %v1143_v10 }
 0x237   :  { %v1146_v25 = vpack.c.bf16 %v1144_v23, %v1144_v23 }
 0x239   :  { %1371 = vmatprep.mubr.bf16.mxu0 %v1146_v25 }
 0x23a   :  { %1372 = vmatmul.mubr.bf16.vlgmr.msra.gmra.mxu0 %v1145_v6 }
 0x2fa   :  { %v1373_v24 = vpop.f32.mrf.mxu0 }
 0x2fb   :  { %v1380_v13 = vadd.f32 %v1373_v24, %v1120_v4 }
 0x2fc   :  { %v1375_v43 = vpop.f32.mrf.mxu0 }
 0x2fd   :  { %v1381_v20 = vadd.f32 %v1375_v43, %v1122_v51 }
 0x2fe   :  { %v1377_v26 = vpop.f32.mrf.mxu0 }
 0x2ff   :  { %v1382_v27 = vadd.f32 %v1381_v20, %v1380_v13 }
 0x300   :  { %v1378_v33 = vpop.f32.mrf.mxu0 }
 0x301   :  { %1383 = vadd.xlane.f32.xlu1 %v1382_v27 }
 0x305   :  { %1439 = vadd.xlane.f32.xlu1 %v1438_v32 }
 0x38a   :  { %v1384_v0 = vpop.xlane.xlu1 %1383 }
 0x38b   :  { %v1386_v36 = vmul.f32 0.00390625, %v1384_v0 }
 0x38d   :  { %v1387_v38 = vsub.f32 %v1380_v13, %v1386_v36  ;;  %v1388_v39 = vsub.f32 %v1381_v20, %v1386_v36  ;;  %v2569_v36 = vand.u32 127, %v1401_v12 }
 0x38e   :  { %v1440_v57 = vpop.xlane.xlu1 %1439 }
 0x38f   :  { %v1441_v14 = vmax.f32 %v1440_v57, 1e-24  ;;  %v1389_v31 = vmul.f32 %v1387_v38, %v1387_v38  ;;  %v1390_v40 = vmul.f32 %v1388_v39, %v1388_v39  ;;  %vm1528_vm8 = vcmp.eq.s32.totalorder %v2557_v50, %v2569_v36 }
 0x390   :  { %vm1632_vm1 = vcmp.eq.s32.totalorder %v2569_v36, 0  ;;  %vm1636_vm2 = vcmp.eq.s32.totalorder %v2569_v36, 1  ;;  %vm1641_vm3 = vcmp.eq.s32.totalorder %v2569_v36, 2 }
 0x391   :  { %2012 = vrsqrt.f32 %v1441_v14  ;;  %v1391_v41 = vadd.f32 %v1390_v40, %v1389_v31 }
 0x393   :  { %1392 = vadd.xlane.f32.xlu0 %v1391_v41 }
 0x39e   :  { %v2013_v35 = vpop.eup %2012 }
 0x39f   :  { %v1444_v42 = vmul.f32 %v2013_v35, %v644_v55  ;;  %v1443_v46 = vmul.f32 %v2013_v35, %v642_v59  ;;  %v1418_v59 = vrot.slane %v1413_v1, %v1403_v52  ;;  %v1422_v55 = vrot.slane %v1413_v1, %v1407_v53 }
 0x3a1   :  { %1484 = vmatprep.subr.mxu1 %v1444_v42 }
 0x3a2   :  { %1485 = vmatpush1.xpose.msra.mxu1 %v1443_v46 }
 0x41c   :  { %v1393_v47 = vpop.xlane.xlu0 %1392 }
 0x41d   :  { %v1394_v48 = vmul.f32 0.00390625, %v1393_v47 }
 0x41f   :  { %v1395_v49 = vadd.f32 1e-05, %v1394_v48 }
 0x421   :  { %2014 = vrsqrt.f32 %v1395_v49 }
 0x42e   :  { %v2015_v2 = vpop.eup %2014 }
 0x42f   :  { %v1397_v58 = vmul.f32 %v2015_v2, %v1387_v38  ;;  %v1398_v37 = vmul.f32 %v2015_v2, %v1388_v39 }
 0x431   :  { %v1411_v61 = vmul.f32 %v1404_v54, %v1397_v58  ;;  %v1412_v62 = vmul.f32 %v1408_v28, %v1398_v37 }
 0x433   :  { %v1425_v4 = vadd.f32 %v1418_v59, %v1411_v61  ;;  %v1426_v5 = vadd.f32 %v1422_v55, %v1412_v62 }
 0x435   :  { %v1427_v51 = vmul.f32 %v1425_v4, %v1425_v4  ;;  %v1428_v7 = vmul.f32 %v1426_v5, %v1426_v5 }
 0x437   :  { %v1429_v60 = vadd.f32 %v1428_v7, %v1427_v51 }
 0x439   :  { %1430 = vadd.xlane.f32.xlu0 %v1429_v60 }
 0x4c2   :  { %v1431_v45 = vpop.xlane.xlu0 %1430 }
 0x4c3   :  { %v1432_v9 = vmax.f32 %v1431_v45, 1e-24 }
 0x4c5   :  { %2016 = vrsqrt.f32 %v1432_v9 }
 0x4d2   :  { %v2017_v11 = vpop.eup %2016 }
 0x4d3   :  { %v1434_v56 = vmul.f32 %v2017_v11, %v1425_v4  ;;  %v1435_v15 = vmul.f32 %v2017_v11, %v1426_v5 }
 0x4d5   :  { %v1445_v18 = vmul.f32 %v1434_v56, %v1434_v56  ;;  %v1446_v16 = vmul.f32 %v1435_v15, %v1435_v15 }
 0x4d7   :  { %v1447_v44 = vadd.f32 %v1446_v16, %v1445_v18 }
 0x4d9   :  { %1448 = vadd.xlane.f32.xlu0 %v1447_v44 }
 0x562   :  { %v1449_v8 = vpop.xlane.xlu0 %1448 }
 0x563   :  { %v1450_v17 = vmax.f32 %v1449_v8, 1e-24 }
 0x565   :  { %2018 = vrsqrt.f32 %v1450_v17 }
 0x572   :  { %v2019_v63 = vpop.eup %2018 }
 0x573   :  { %v1453_v19 = vmul.f32 %v2019_v63, %v1435_v15  ;;  %v1452_v3 = vmul.f32 %v2019_v63, %v1434_v56  ;;  %v2029_v15 = vmov 0.0  }
 0x575   :  { %1518 = vmatprep.mubr.f32.mxu1 %v1453_v19 }
 0x576   :  { %1519 = vmatmul.mubr.f32.vlgmr.msra.gmra.mxu1 %v1452_v3 }
 0x636   :  { %v1520_v21 = vpop.f32.mrf.mxu1 }
 0x637   :  { %v1540_v22 = vsel %vm1530_vm7, %v1520_v21, -inf  ;;  %v1529_v39 = vsel %vm1528_vm8, %v1520_v21, 0.0 }
 0x638   :  { %1541 = vmax.xlane.f32.xlu1 %v1540_v22  ;;  %v1522_v10 = vpop.f32.mrf.mxu1  ;;  %v1560_v23 = vrot.slane %v1540_v22, 4  ;;  %v1531_v14 = vsel %vm1530_vm7, %v1529_v39, 0.0 }
 0x639   :  { %v1534_v31 = vrot.slane %v1531_v14, 4 }
 0x63a   :  { %v1561_v25 = vmax.f32 %v1540_v22, %v1560_v23 }
 0x63b   :  { %v1535_v40 = vadd.f32 %v1534_v31, %v1531_v14 }
 0x63c   :  { %v1562_v6 = vrot.slane %v1561_v25, 2 }
 0x63d   :  { %v1536_v41 = vrot.slane %v1535_v40, 2 }
 0x63e   :  { %v1563_v24 = vmax.f32 %v1561_v25, %v1562_v6 }
 0x63f   :  { %v1537_v47 = vadd.f32 %v1536_v41, %v1535_v40  ;;  %v1745_v41 = vsel %vm1632_vm1, 1.0, %v2029_v15 }
 0x640   :  { %v1564_v43 = vrot.slane %v1563_v24, 1 }
 0x641   :  { %v1538_v30 = vrot.slane %v1537_v47, 1 }
 0x642   :  { %v1565_v13 = vmax.f32 %v1563_v24, %v1564_v43 }
 0x643   :  { %v1539_v28 = vadd.f32 %v1538_v30, %v1537_v47  ;;  %v1747_v47 = vsel %vm1641_vm3, 1.0, %v2029_v15 }
 0x644   :  { %v1566_v20 = vsub.f32 %v1520_v21, %v1565_v13  ;;  %vm1613_vm10 = vcmp.eq.f32.partialorder %v1520_v21, %v1565_v13 }
 0x645   :  { %v1614_v55 = vsel %vm1613_vm10, %v2557_v50, 8 }
 0x646   :  { %v1567_v26 = vmul.f32 1.442695, %v1566_v20  ;;  %v1615_v61 = vsel %vm1530_vm7, %v1614_v55, 2147483647 }
 0x647   :  { %v1616_v62 = vrot.slane %v1615_v61, 4 }
 0x648   :  { %2020 = vpow2.f32 %v1567_v26 }
 0x649   :  { %vm1617_vm11 = vcmp.lt.s32.totalorder %v1615_v61, %v1616_v62 }
 0x64a   :  { %v1618_v4 = vsel %vm1617_vm11, %v1615_v61, %v1616_v62 }
 0x64b   :  { %v1619_v5 = vrot.slane %v1618_v4, 2 }
 0x64d   :  { %vm1620_vm12 = vcmp.lt.s32.totalorder %v1618_v4, %v1619_v5 }
 0x64e   :  { %v1621_v51 = vsel %vm1620_vm12, %v1618_v4, %v1619_v5 }
 0x64f   :  { %v1622_v7 = vrot.slane %v1621_v51, 1 }
 0x651   :  { %vm1623_vm13 = vcmp.lt.s32.totalorder %v1621_v51, %v1622_v7 }
 0x652   :  { %v1624_v45 = vsel %vm1623_vm13, %v1621_v51, %v1622_v7 }
 0x653   :  { %vm1625_vm14 = vcmp.eq.s32.totalorder %v1624_v45, %v2569_v36 }
 0x654   :  { %v1744_v18 = vsel %vm1625_vm14, 1.0, %v2029_v15 }
 0x655   :  { %v2021_v29 = vpop.eup %2020  ;;  %v1628_v16 = vsel %vm1530_vm7, %v1744_v18, 0.0 }
 0x656   :  { %v1569_v27 = vsel %vm1530_vm7, %v2021_v29, 0.0 }
 0x657   :  { %v1570_v33 = vrot.slane %v1569_v27, 4 }
 0x659   :  { %v1571_v34 = vadd.f32 %v1570_v33, %v1569_v27 }
 0x65b   :  { %v1572_v32 = vrot.slane %v1571_v34, 2 }
 0x65d   :  { %v1573_v0 = vadd.f32 %v1572_v32, %v1571_v34 }
 0x65f   :  { %v1574_v38 = vrot.slane %v1573_v0, 1 }
 0x661   :  { %v1575_v57 = vadd.f32 %v1574_v38, %v1573_v0 }
 0x663   :  { %2022 = vlog2.f32 %v1575_v57 }
 0x670   :  { %v2023_v35 = vpop.eup %2022 }
 0x671   :  { %v1577_v52 = vmul.f32 0.6931472, %v2023_v35  ;;  %v1746_v35 = vsel %vm1636_vm2, 1.0, %v2029_v15 }
 0x673   :  { %v1578_v54 = vadd.f32 %v1577_v52, %v1565_v13 }
 0x675   :  { %v1579_v2 = vsub.f32 %v1578_v54, %v1539_v28 }
 0x677   :  { %v1580_v58 = vsel %vm1530_vm7, %v1579_v2, 0.0 }
 0x6c1   :  { %v1542_v42 = vpop.xlane.xlu1 %1541 }
 0x6c2   :  { %v1543_v46 = vsub.f32 %v1520_v21, %v1542_v42  ;;  %vm1586_vm9 = vcmp.eq.f32.partialorder %v1520_v21, %v1542_v42 }
 0x6c3   :  { %v1587_v48 = vsel %vm1586_vm9, %v2569_v36, 8 }
 0x6c4   :  { %v1544_v49 = vmul.f32 1.442695, %v1543_v46  ;;  %v1588_v12 = vsel %vm1530_vm7, %v1587_v48, 2147483647 }
 0x6c5   :  { %v1590_v53 = vshra.s32 %v1588_v12, 16  ;;  %v1589_v60 = vand.u32 65535, %v1588_v12 }
 0x6c6   :  { %2024 = vpow2.f32 %v1544_v49 }
 0x6c7   :  { %v1592_v1 = vcvt.s32.f32 %v1590_v53  ;;  %v1591_v11 = vcvt.s32.f32 %v1589_v60 }
 0x6c9   :  { %1593 = vmin.xlane.f32.xlu0 %v1592_v1 }
 0x6cd   :  { %1532 = vadd.xlane.f32.xlu0 %v1531_v14 }
 0x6d1   :  { %1581 = vadd.xlane.f32.xlu0 %v1580_v58 }
 0x6d3   :  { %v2025_v37 = vpop.eup %2024 }
 0x6d4   :  { %v1546_v59 = vsel %vm1530_vm7, %v2025_v37, 0.0 }
 0x6d5   :  { %1547 = vadd.xlane.f32.xlu1 %v1546_v59 }
 0x752   :  { %v1594_v9 = vpop.xlane.xlu0 %1593 }
 0x753   :  { %vm1595_vm15 = vcmp.eq.f32.partialorder %v1592_v1, %v1594_v9  ;;  %v1600_v23 = vcvt.f32.s32 %v1594_v9 }
 0x754   :  { %v1596_v56 = vsel %vm1595_vm15, %v1591_v11, inf }
 0x755   :  { %1597 = vmin.xlane.f32.xlu1 %v1596_v56  ;;  %v1601_v24 = vshll.u32 %v1600_v23, 16 }
 0x756   :  { %v1533_v19 = vpop.xlane.xlu0 %1532 }
 0x759   :  { %1629 = vadd.xlane.f32.xlu1 %v1628_v16 }
 0x75a   :  { %v1582_v33 = vpop.xlane.xlu0 %1581 }
 0x75b   :  { %v1583_v0 = vmul.f32 0.125, %v1582_v33 }
 0x75e   :  { %v1548_v44 = vpop.xlane.xlu1 %1547 }
 0x75f   :  { %2026 = vlog2.f32 %v1548_v44 }
 0x76c   :  { %v2027_v8 = vpop.eup %2026 }
 0x76d   :  { %v1550_v17 = vmul.f32 0.6931472, %v2027_v8 }
 0x76f   :  { %v1551_v63 = vadd.f32 %v1550_v17, %v1542_v42 }
 0x771   :  { %v1552_v3 = vsub.f32 %v1551_v63, %v1533_v19 }
 0x773   :  { %v1553_v21 = vrot.slane %v1552_v3, 4 }
 0x775   :  { %v1554_v22 = vadd.f32 %v1553_v21, %v1552_v3 }
 0x777   :  { %v1555_v10 = vrot.slane %v1554_v22, 2 }
 0x779   :  { %v1556_v25 = vadd.f32 %v1555_v10, %v1554_v22 }
 0x77b   :  { %v1557_v43 = vrot.slane %v1556_v25, 1 }
 0x77d   :  { %v1558_v26 = vadd.f32 %v1557_v43, %v1556_v25 }
 0x77f   :  { %v1559_v32 = vmul.f32 0.125, %v1558_v26 }
 0x781   :  { %v1584_v57 = vadd.f32 %v1583_v0, %v1559_v32 }
 0x7de   :  { %v1598_v6 = vpop.xlane.xlu1 %1597 }
 0x7df   :  { %v1599_v13 = vcvt.f32.s32 %v1598_v6 }
 0x7e1   :  { %v1602_v20 = vadd.s32 %v1601_v24, %v1599_v13 }
 0x7e2   :  { %v1630_v31 = vpop.xlane.xlu1 %1629 }
 0x7e3   :  { %vm1603_vm0 = vcmp.eq.s32.totalorder %v1602_v20, %v2557_v50  ;;  %v1585_v50 = vmul.f32 0.5, %v1584_v57  ;;  %v1631_v46 = vmul.f32 0.125, %v1630_v31 }
 0x7e4   :  { %v1743_v29 = vsel %vm1603_vm0, 1.0, %v2029_v15 }
 0x7e5   :  { %v1606_v27 = vrot.slane %v1743_v29, 4  ;;  %v1635_v49 = vmul.f32 %v1745_v41, %v1585_v50  ;;  %v1644_v52 = vmul.f32 %v1747_v47, %v1631_v46 }
 0x7e7   :  { %v1607_v34 = vadd.f32 %v1743_v29, %v1606_v27 }
 0x7e9   :  { %v1608_v38 = vrot.slane %v1607_v34, 2 }
 0x7eb   :  { %v1609_v39 = vadd.f32 %v1608_v38, %v1607_v34 }
 0x7ed   :  { %v1610_v14 = vrot.slane %v1609_v39, 1 }
 0x7ef   :  { %v1611_v40 = vadd.f32 %v1610_v14, %v1609_v39 }
 0x7f1   :  { %v1612_v42 = vmul.f32 0.125, %v1611_v40 }
 0x7f3   :  { %v1639_v48 = vmul.f32 %v1746_v35, %v1612_v42 }
 0x7f5   :  { %v1640_v12 = vadd.f32 %v1639_v48, %v1635_v49 }
 0x7f7   :  { %v1645_v53 = vadd.f32 %v1644_v52, %v1640_v12 }
 0x7f9   :  { %1646 = vst [vmem:[%s2600_s11] sm:$0x1] %v1645_v53 }

</bundles_post_ra>
